<compile_context>
chip_gen: v5e
topology: v5e:2x2
jax: 0.10.0
libtpu: 0.0.40
codegen_flags: <defaults>
</compile_context>

<pallas_src>
import numpy as np
import jax
import jax.numpy as jnp
from jax.experimental import pallas as pl
from jax.experimental.pallas import tpu as pltpu

N_SPEED_BINS = 21
N_TURN_BINS = 21
N_OUT = N_SPEED_BINS + N_TURN_BINS   # 42
SEQ_LEN = 10                         # forced by fc_end(in_features=10)

BLP = 128        # padded lane width for fused (batch*seq) positions
NOUT_P = 128     # padded output-feature lane width (sliced to 42 in wrapper)

# (block input channels, block mid channels, block output channels)  [logical]
BLOCK_CHANNELS = [(16, 2, 4), (4, 4, 8), (8, 8, 16)]


def _cpad(c):
    return ((c + 7) // 8) * 8


PAD_BLOCKS = [(_cpad(ci), _cpad(m), _cpad(co)) for ci, m, co in BLOCK_CHANNELS]


# ---------------- slab layouts (shared by packer and kernel) -----------------
def _build_w_layout():
    """MXU weight slab: fused conv weights, uniform 48-column contraction."""
    layout, off = {}, 0
    for i, (ciP, mP, coP) in enumerate(PAD_BLOCKS, 1):
        # conv-a taps (rows 0..mP-1) + 1x1 skip (rows mP..mP+coP-1, center cols)
        layout[f"b{i}_wab"] = (off, mP + coP); off += mP + coP
        layout[f"b{i}_wb"] = (off, coP); off += coP
    layout["ce_w"] = (off, 8); off += 8          # conv_end: row 0 real
    return layout, off


W_LAYOUT, W_ROWS = _build_w_layout()
W_COLS = 48  # uniform fused-tap contraction width (3 * max padded Cin)


def _build_v_layout():
    """VPU vector slab: per-channel values pre-broadcast across 128 lanes."""
    layout, off = {}, 0

    def add(name, rows):
        nonlocal off
        layout[name] = (off, rows)
        off += rows

    for nm in ("c1_wp", "c1_wc", "c1_wn", "c1_b", "bn1_g", "bn1_b"):
        add(nm, 16)
    for i, (ciP, mP, coP) in enumerate(PAD_BLOCKS, 1):
        add(f"b{i}_ba", mP)
        add(f"b{i}_ga", mP)
        add(f"b{i}_bea", mP)
        add(f"b{i}_bb", coP)
        add(f"b{i}_gb", coP)
        add(f"b{i}_beb", coP)
        add(f"b{i}_bp", coP)
    add("ce_b", 8)        # row 0: conv_end bias (lane-broadcast scalar)
    add("fc_b", 8)        # row 0: fc bias laid across lanes (42 real values)
    add("m_prev", 8)      # row 0: kill x[l-1] tap at sequence start
    add("m_next", 8)      # row 0: kill x[l+1] tap at sequence end
    add("m_fc", 16)       # rows 0..B-1: one-hot (batch -> its 10 lanes) selector
    return layout, off


V_LAYOUT, V_ROWS = _build_v_layout()


# --------------------------------- kernel ------------------------------------
def make_kernel(B_pad):
    f32 = jnp.float32

    def kernel(x_ref, w_ref, v_ref, fcw_ref, smat_ref, out_ref):
        def vget(name):
            off, rows = V_LAYOUT[name]
            return v_ref[pl.ds(off, rows), :]

        def vrow(name):
            off, _ = V_LAYOUT[name]
            return v_ref[pl.ds(off, 1), :]

        def wget(name):
            off, rows = W_LAYOUT[name]
            return w_ref[pl.ds(off, rows), :]

        # precomputed lane masks / bn-stats matrix (loaded once)
        m_prev = vrow("m_prev")                  # (1, BLP)
        m_next = vrow("m_next")                  # (1, BLP)
        smat = smat_ref[...]                     # (BLP, BLP): 1/BL on valid rows
        zpad24 = jnp.zeros((24, BLP), f32)       # hoisted; reused by every narrow stack

        def lrelu(h):                            # LeakyReLU(negative_slope=0.01)
            return jnp.maximum(h, 0.01 * h)

        def taps(h):
            # neighbor taps via XLU lane rotation + 0/1 per-sequence boundary masks
            hp = pltpu.roll(h, shift=1, axis=1) * m_prev          # h[:, l-1]
            hn = pltpu.roll(h, shift=BLP - 1, axis=1) * m_next    # h[:, l+1]
            return hp, hn

        def stack48(h):
            # [h_prev; h; h_next] stacked on sublanes, padded to the uniform
            # 48-row contraction (pad rows hit zero weight columns).
            hp, hn = taps(h)
            parts = [hp, h, hn]
            if 3 * h.shape[0] < 48:
                parts.append(zpad24)
            return jnp.concatenate(parts, axis=0)                 # (48, BLP)

        def bnorm(h, g, be):
            # Training-mode BatchNorm1d.  One MXU dot of [h; h*h] against the
            # lane-masked sum matrix gives mu and E[x^2] already lane-broadcast
            # (pad lanes of h are excluded by the zero rows of smat).
            # TODO(synk): one-pass E[x^2]-mu^2 in f32; reference runs in f64.
            C = h.shape[0]
            stats = jnp.dot(jnp.concatenate([h, h * h], axis=0), smat,
                            preferred_element_type=f32)           # (2C, BLP)
            mu = stats[:C]
            var = jnp.maximum(stats[C:] - mu * mu, 0.0)
            return (h - mu) * (g * jax.lax.rsqrt(var + 1e-5)) + be

        # ---- conv1 (Cin=1): VPU broadcast-MAC, no MXU ----
        xf = x_ref[...]                                           # (8, BLP), row 0 = data
        x0 = xf[0:1, :]
        xp = pltpu.roll(xf, shift=1, axis=1)[0:1, :] * m_prev
        xn = pltpu.roll(xf, shift=BLP - 1, axis=1)[0:1, :] * m_next
        h = (vget("c1_wp") * xp + vget("c1_wc") * x0
             + vget("c1_wn") * xn + vget("c1_b"))                 # (16, BLP)
        h = bnorm(lrelu(h), vget("bn1_g"), vget("bn1_b"))         # conv1 -> LeakyReLU -> bn1

        # ---- residual blocks: conv3->bn->lrelu->conv3->bn (+ fused 1x1 skip) ----
        for i, (ciP, mP, coP) in enumerate(PAD_BLOCKS, 1):
            hs = stack48(h)
            # single dot: rows [:mP] = conv-a pre-activation, rows [mP:] = skip
            yab = jnp.dot(wget(f"b{i}_wab"), hs, preferred_element_type=f32)
            ya = yab[:mP] + vget(f"b{i}_ba")
            ident = yab[mP:] + vget(f"b{i}_bp")
            ya = lrelu(bnorm(ya, vget(f"b{i}_ga"), vget(f"b{i}_bea")))
            yb = jnp.dot(wget(f"b{i}_wb"), stack48(ya),
                         preferred_element_type=f32) + vget(f"b{i}_bb")
            yb = bnorm(yb, vget(f"b{i}_gb"), vget(f"b{i}_beb"))
            h = lrelu(yb + ident)                                 # (coP, BLP)

        # ---- conv_end (Cout=1): one MXU dot, take output row 0 ----
        ce = jnp.dot(wget("ce_w"), stack48(h), preferred_element_type=f32)  # (8, BLP)
        h_end = ce[0:1, :] + vrow("ce_b")                         # (1, BLP)

        # ---- flatten + fc_end: per-batch lane select + one (B_pad,128)@(128,128) dot ----
        m_fc = v_ref[pl.ds(V_LAYOUT["m_fc"][0], B_pad), :]        # masks pad lanes too
        fc_in = m_fc * h_end                                      # (B_pad, BLP)
        out_ref[...] = (jnp.dot(fc_in, fcw_ref[...], preferred_element_type=f32)
                        + vrow("fc_b"))                           # (B_pad, NOUT_P)

    return kernel


# ------------------------------ parameters -----------------------------------
def init_params(key):
    """Deterministic synthetic parameters with natural (PyTorch-like) shapes."""
    keys = iter(jax.random.split(key, 64))

    def nrm(shape, scale=0.1):
        return (scale * jax.random.normal(next(keys), shape)).astype(jnp.float32)

    p = {}
    p["conv1_w"] = nrm((16, 1, 3))
    p["conv1_b"] = nrm((16,))
    p["bn1_g"] = 1.0 + nrm((16,))
    p["bn1_b"] = nrm((16,))
    for i, (cin, mid, cout) in enumerate(BLOCK_CHANNELS, 1):
        p[f"b{i}_wa"] = nrm((mid, cin, 3))
        p[f"b{i}_ba"] = nrm((mid,))
        p[f"b{i}_ga"] = 1.0 + nrm((mid,))
        p[f"b{i}_bea"] = nrm((mid,))
        p[f"b{i}_wb"] = nrm((cout, mid, 3))
        p[f"b{i}_bb"] = nrm((cout,))
        p[f"b{i}_gb"] = 1.0 + nrm((cout,))
        p[f"b{i}_beb"] = nrm((cout,))
        p[f"b{i}_wp"] = nrm((cout, cin))
        p[f"b{i}_bp"] = nrm((cout,))
    p["ce_w"] = nrm((1, 16, 3))
    p["ce_b"] = nrm((1,))
    p["fc_w"] = nrm((N_OUT, SEQ_LEN))
    p["fc_b"] = nrm((N_OUT,))
    return p


def pack_params(p, B):
    """One-time HOST-side packing of the ~38 tiny tensors into 5 device slabs.

    Called once outside jit (it must NOT sit on the per-call jitted path)."""
    BL = B * SEQ_LEN
    assert BL <= BLP, "single-tile kernel: B*L must fit in one 128-lane tile"
    f = np.float32
    pn = {k: np.asarray(v, f) for k, v in p.items()}

    # ---- MXU weight slab: fused 3-tap conv weights (+ fused 1x1 skips) ----
    wslab = np.zeros((W_ROWS, W_COLS), f)

    def fuse3_into(row0, w, ciP):
        # PyTorch Conv1d weight (Cout, Cin, 3): k=0 -> x[l-1], k=1 -> x[l], k=2 -> x[l+1]
        co, ci, _ = w.shape
        for k in range(3):
            wslab[row0:row0 + co, k * ciP:k * ciP + ci] = w[:, :, k]

    for i, ((ci, mid, co), (ciP, mP, coP)) in enumerate(
            zip(BLOCK_CHANNELS, PAD_BLOCKS), 1):
        off_ab = W_LAYOUT[f"b{i}_wab"][0]
        fuse3_into(off_ab, pn[f"b{i}_wa"], ciP)                       # conv-a taps
        wslab[off_ab + mP:off_ab + mP + co, ciP:ciP + ci] = pn[f"b{i}_wp"]  # skip, center cols
        fuse3_into(W_LAYOUT[f"b{i}_wb"][0], pn[f"b{i}_wb"], mP)       # conv-b taps
    fuse3_into(W_LAYOUT["ce_w"][0], pn["ce_w"], 16)                   # conv_end, row 0

    # ---- VPU vector slab: per-channel values broadcast across 128 lanes ----
    vslab = np.zeros((V_ROWS, BLP), f)

    def put(name, vec):
        off, _ = V_LAYOUT[name]
        v = np.asarray(vec, f).reshape(-1)
        vslab[off:off + v.shape[0], :] = v[:, None]

    put("c1_wp", pn["conv1_w"][:, 0, 0])
    put("c1_wc", pn["conv1_w"][:, 0, 1])
    put("c1_wn", pn["conv1_w"][:, 0, 2])
    put("c1_b", pn["conv1_b"])
    put("bn1_g", pn["bn1_g"])
    put("bn1_b", pn["bn1_b"])
    for i in (1, 2, 3):
        for nm in ("ba", "ga", "bea", "bb", "gb", "beb", "bp"):
            put(f"b{i}_{nm}", pn[f"b{i}_{nm}"])
    put("ce_b", pn["ce_b"])
    vslab[V_LAYOUT["fc_b"][0], :N_OUT] = pn["fc_b"]                   # lane-varying row

    # boundary masks + per-batch lane selector (precomputed, item 5 of review)
    lane = np.arange(BLP)
    vslab[V_LAYOUT["m_prev"][0], :] = (lane % SEQ_LEN != 0).astype(f)
    vslab[V_LAYOUT["m_next"][0], :] = (lane % SEQ_LEN != SEQ_LEN - 1).astype(f)
    foff = V_LAYOUT["m_fc"][0]
    for b in range(B):
        vslab[foff + b, b * SEQ_LEN:(b + 1) * SEQ_LEN] = 1.0

    # ---- fc weight, tiled once per batch element, padded to (BLP, NOUT_P) ----
    fcw_t = np.zeros((BLP, NOUT_P), f)
    fcw_t[:BL, :N_OUT] = np.tile(pn["fc_w"].T, (B, 1))                # (L, N_OUT) tiled

    # ---- BatchNorm sum matrix: 1/(B*L) on valid-lane rows, 0 on pad rows ----
    smat = np.zeros((BLP, BLP), f)
    smat[:BL, :] = 1.0 / BL

    return (jnp.asarray(wslab), jnp.asarray(vslab),
            jnp.asarray(fcw_t), jnp.asarray(smat))


# -------------------------------- wrapper ------------------------------------
@jax.jit
def resnet_forward(x, wslab, vslab, fcw_t, smat):
    """Per-call path: pad x into its lane-dense row and launch the kernel."""
    B, L = x.shape
    assert L == SEQ_LEN, "fc_end(in_features=10) forces sequence length 10"
    BL = B * L
    assert BL <= BLP, "single-tile kernel: B*L must fit in one 128-lane tile"
    B_pad = ((B + 7) // 8) * 8

    x_row = jnp.zeros((8, BLP), jnp.float32).at[0, :BL].set(
        x.reshape(BL).astype(jnp.float32))

    out = pl.pallas_call(
        make_kernel(B_pad),
        out_shape=jax.ShapeDtypeStruct((B_pad, NOUT_P), jnp.float32),
        in_specs=[pl.BlockSpec(memory_space=pltpu.MemorySpace.VMEM)] * 5,
        out_specs=pl.BlockSpec(memory_space=pltpu.MemorySpace.VMEM),
    )(x_row, wslab, vslab, fcw_t, smat)
    return out[:B, :N_OUT]


if __name__ == "__main__":
    key = jax.random.PRNGKey(0)
    k_x, k_p = jax.random.split(key)

    B = 2
    x = jax.random.normal(k_x, (B, SEQ_LEN), dtype=jnp.float32)
    params = init_params(k_p)

    # Pack ONCE on the host (outside jit), then call the jitted forward.
    wslab, vslab, fcw_t, smat = pack_params(params, B)

    out = resnet_forward(x, wslab, vslab, fcw_t, smat)
    out = jax.block_until_ready(out)

    assert out.shape == (B, N_OUT), out.shape
    assert bool(jnp.all(jnp.isfinite(out)))
    print("KERNEL_OK")
</pallas_src>

<mosaic_0001>
module attributes {stable_mosaic.version = 11 : i64} {
  func.func @kernel(%arg0: memref<8x128xf32, #tpu.memory_space<vmem>>, %arg1: memref<96x48xf32, #tpu.memory_space<vmem>>, %arg2: memref<344x128xf32, #tpu.memory_space<vmem>>, %arg3: memref<128x128xf32, #tpu.memory_space<vmem>>, %arg4: memref<128x128xf32, #tpu.memory_space<vmem>>, %arg5: memref<8x128xf32, #tpu.memory_space<vmem>>) attributes {dimension_semantics = [], scalar_prefetch = 0 : i64, scratch_operands = 0 : i64, tpu.core_type = #tpu.core_type<tc>} {
    %c312 = arith.constant 312 : index
    %c0 = arith.constant 0 : index
    %0 = vector.load %arg2[%c312, %c0] : memref<344x128xf32, #tpu.memory_space<vmem>>, vector<1x128xf32>
    %c320 = arith.constant 320 : index
    %c0_0 = arith.constant 0 : index
    %1 = vector.load %arg2[%c320, %c0_0] : memref<344x128xf32, #tpu.memory_space<vmem>>, vector<1x128xf32>
    %c0_1 = arith.constant 0 : index
    %c0_2 = arith.constant 0 : index
    %2 = vector.load %arg4[%c0_1, %c0_2] : memref<128x128xf32, #tpu.memory_space<vmem>>, vector<128x128xf32>
    %cst = arith.constant 0.000000e+00 : f32
    %3 = vector.broadcast %cst : f32 to vector<24x128xf32>
    %c0_3 = arith.constant 0 : index
    %c0_4 = arith.constant 0 : index
    %4 = vector.load %arg0[%c0_3, %c0_4] : memref<8x128xf32, #tpu.memory_space<vmem>>, vector<8x128xf32>
    %5 = vector.extract_strided_slice %4 {offsets = [0, 0], sizes = [1, 128], strides = [1, 1]} : vector<8x128xf32> to vector<1x128xf32>
    %c1_i32 = arith.constant 1 : i32
    %6 = tpu.dynamic_rotate %4 by %c1_i32 dim 1 : vector<8x128xf32>, i32 -> vector<8x128xf32>
    %7 = vector.extract_strided_slice %6 {offsets = [0, 0], sizes = [1, 128], strides = [1, 1]} : vector<8x128xf32> to vector<1x128xf32>
    %8 = arith.mulf %7, %0 : vector<1x128xf32>
    %c127_i32 = arith.constant 127 : i32
    %9 = tpu.dynamic_rotate %4 by %c127_i32 dim 1 : vector<8x128xf32>, i32 -> vector<8x128xf32>
    %10 = vector.extract_strided_slice %9 {offsets = [0, 0], sizes = [1, 128], strides = [1, 1]} : vector<8x128xf32> to vector<1x128xf32>
    %11 = arith.mulf %10, %1 : vector<1x128xf32>
    %c0_5 = arith.constant 0 : index
    %c0_6 = arith.constant 0 : index
    %12 = vector.load %arg2[%c0_5, %c0_6] : memref<344x128xf32, #tpu.memory_space<vmem>>, vector<16x128xf32>
    %13 = vector.broadcast %8 : vector<1x128xf32> to vector<16x128xf32>
    %14 = arith.mulf %12, %13 : vector<16x128xf32>
    %c16 = arith.constant 16 : index
    %c0_7 = arith.constant 0 : index
    %15 = vector.load %arg2[%c16, %c0_7] : memref<344x128xf32, #tpu.memory_space<vmem>>, vector<16x128xf32>
    %16 = vector.broadcast %5 : vector<1x128xf32> to vector<16x128xf32>
    %17 = arith.mulf %15, %16 : vector<16x128xf32>
    %18 = arith.addf %14, %17 : vector<16x128xf32>
    %c32 = arith.constant 32 : index
    %c0_8 = arith.constant 0 : index
    %19 = vector.load %arg2[%c32, %c0_8] : memref<344x128xf32, #tpu.memory_space<vmem>>, vector<16x128xf32>
    %20 = vector.broadcast %11 : vector<1x128xf32> to vector<16x128xf32>
    %21 = arith.mulf %19, %20 : vector<16x128xf32>
    %22 = arith.addf %18, %21 : vector<16x128xf32>
    %c48 = arith.constant 48 : index
    %c0_9 = arith.constant 0 : index
    %23 = vector.load %arg2[%c48, %c0_9] : memref<344x128xf32, #tpu.memory_space<vmem>>, vector<16x128xf32>
    %24 = arith.addf %22, %23 : vector<16x128xf32>
    %cst_10 = arith.constant 0.00999999977 : f32
    %25 = vector.broadcast %cst_10 : f32 to vector<16x128xf32>
    %26 = arith.mulf %25, %24 : vector<16x128xf32>
    %27 = arith.maximumf %24, %26 : vector<16x128xf32>
    %c64 = arith.constant 64 : index
    %c0_11 = arith.constant 0 : index
    %28 = vector.load %arg2[%c64, %c0_11] : memref<344x128xf32, #tpu.memory_space<vmem>>, vector<16x128xf32>
    %c80 = arith.constant 80 : index
    %c0_12 = arith.constant 0 : index
    %29 = vector.load %arg2[%c80, %c0_12] : memref<344x128xf32, #tpu.memory_space<vmem>>, vector<16x128xf32>
    %30 = arith.mulf %27, %27 : vector<16x128xf32>
    %31 = tpu.concatenate %27, %30 in 0 : vector<16x128xf32>, vector<16x128xf32> -> vector<32x128xf32>
    %cst_13 = arith.constant dense<0.000000e+00> : vector<32x128xf32>
    %32 = tpu.matmul %31, %2, %cst_13 {dimension_numbers = #tpu.dot_dimension_numbers<[1], [0], [0], [1], [0, 0, 1, 1], [], []>} : vector<32x128xf32>, vector<128x128xf32>, vector<32x128xf32> -> vector<32x128xf32>
    %33 = vector.extract_strided_slice %32 {offsets = [0, 0], sizes = [16, 128], strides = [1, 1]} : vector<32x128xf32> to vector<16x128xf32>
    %34 = vector.extract_strided_slice %32 {offsets = [16, 0], sizes = [16, 128], strides = [1, 1]} : vector<32x128xf32> to vector<16x128xf32>
    %35 = arith.mulf %33, %33 : vector<16x128xf32>
    %36 = arith.subf %34, %35 : vector<16x128xf32>
    %cst_14 = arith.constant 0.000000e+00 : f32
    %37 = vector.broadcast %cst_14 : f32 to vector<16x128xf32>
    %38 = arith.maximumf %36, %37 : vector<16x128xf32>
    %39 = arith.subf %27, %33 : vector<16x128xf32>
    %cst_15 = arith.constant 9.99999974E-6 : f32
    %40 = vector.broadcast %cst_15 : f32 to vector<16x128xf32>
    %41 = arith.addf %38, %40 : vector<16x128xf32>
    %42 = math.rsqrt %41 : vector<16x128xf32>
    %43 = arith.mulf %28, %42 : vector<16x128xf32>
    %44 = arith.mulf %39, %43 : vector<16x128xf32>
    %45 = arith.addf %44, %29 : vector<16x128xf32>
    %c1_i32_16 = arith.constant 1 : i32
    %46 = tpu.dynamic_rotate %45 by %c1_i32_16 dim 1 : vector<16x128xf32>, i32 -> vector<16x128xf32>
    %47 = vector.broadcast %0 : vector<1x128xf32> to vector<16x128xf32>
    %48 = arith.mulf %46, %47 : vector<16x128xf32>
    %c127_i32_17 = arith.constant 127 : i32
    %49 = tpu.dynamic_rotate %45 by %c127_i32_17 dim 1 : vector<16x128xf32>, i32 -> vector<16x128xf32>
    %50 = vector.broadcast %1 : vector<1x128xf32> to vector<16x128xf32>
    %51 = arith.mulf %49, %50 : vector<16x128xf32>
    %52 = tpu.concatenate %48, %45, %51 in 0 : vector<16x128xf32>, vector<16x128xf32>, vector<16x128xf32> -> vector<48x128xf32>
    %c0_18 = arith.constant 0 : index
    %c0_19 = arith.constant 0 : index
    %53 = vector.load %arg1[%c0_18, %c0_19] : memref<96x48xf32, #tpu.memory_space<vmem>>, vector<16x48xf32>
    %cst_20 = arith.constant dense<0.000000e+00> : vector<16x128xf32>
    %54 = tpu.matmul %53, %52, %cst_20 {dimension_numbers = #tpu.dot_dimension_numbers<[1], [0], [0], [1], [0, 0, 1, 1], [], []>} : vector<16x48xf32>, vector<48x128xf32>, vector<16x128xf32> -> vector<16x128xf32>
    %55 = vector.extract_strided_slice %54 {offsets = [0, 0], sizes = [8, 128], strides = [1, 1]} : vector<16x128xf32> to vector<8x128xf32>
    %c96 = arith.constant 96 : index
    %c0_21 = arith.constant 0 : index
    %56 = vector.load %arg2[%c96, %c0_21] : memref<344x128xf32, #tpu.memory_space<vmem>>, vector<8x128xf32>
    %57 = arith.addf %55, %56 : vector<8x128xf32>
    %58 = vector.extract_strided_slice %54 {offsets = [8, 0], sizes = [8, 128], strides = [1, 1]} : vector<16x128xf32> to vector<8x128xf32>
    %c144 = arith.constant 144 : index
    %c0_22 = arith.constant 0 : index
    %59 = vector.load %arg2[%c144, %c0_22] : memref<344x128xf32, #tpu.memory_space<vmem>>, vector<8x128xf32>
    %60 = arith.addf %58, %59 : vector<8x128xf32>
    %c104 = arith.constant 104 : index
    %c0_23 = arith.constant 0 : index
    %61 = vector.load %arg2[%c104, %c0_23] : memref<344x128xf32, #tpu.memory_space<vmem>>, vector<8x128xf32>
    %c112 = arith.constant 112 : index
    %c0_24 = arith.constant 0 : index
    %62 = vector.load %arg2[%c112, %c0_24] : memref<344x128xf32, #tpu.memory_space<vmem>>, vector<8x128xf32>
    %63 = arith.mulf %57, %57 : vector<8x128xf32>
    %64 = tpu.concatenate %57, %63 in 0 : vector<8x128xf32>, vector<8x128xf32> -> vector<16x128xf32>
    %cst_25 = arith.constant dense<0.000000e+00> : vector<16x128xf32>
    %65 = tpu.matmul %64, %2, %cst_25 {dimension_numbers = #tpu.dot_dimension_numbers<[1], [0], [0], [1], [0, 0, 1, 1], [], []>} : vector<16x128xf32>, vector<128x128xf32>, vector<16x128xf32> -> vector<16x128xf32>
    %66 = vector.extract_strided_slice %65 {offsets = [0, 0], sizes = [8, 128], strides = [1, 1]} : vector<16x128xf32> to vector<8x128xf32>
    %67 = vector.extract_strided_slice %65 {offsets = [8, 0], sizes = [8, 128], strides = [1, 1]} : vector<16x128xf32> to vector<8x128xf32>
    %68 = arith.mulf %66, %66 : vector<8x128xf32>
    %69 = arith.subf %67, %68 : vector<8x128xf32>
    %cst_26 = arith.constant 0.000000e+00 : f32
    %70 = vector.broadcast %cst_26 : f32 to vector<8x128xf32>
    %71 = arith.maximumf %69, %70 : vector<8x128xf32>
    %72 = arith.subf %57, %66 : vector<8x128xf32>
    %cst_27 = arith.constant 9.99999974E-6 : f32
    %73 = vector.broadcast %cst_27 : f32 to vector<8x128xf32>
    %74 = arith.addf %71, %73 : vector<8x128xf32>
    %75 = math.rsqrt %74 : vector<8x128xf32>
    %76 = arith.mulf %61, %75 : vector<8x128xf32>
    %77 = arith.mulf %72, %76 : vector<8x128xf32>
    %78 = arith.addf %77, %62 : vector<8x128xf32>
    %cst_28 = arith.constant 0.00999999977 : f32
    %79 = vector.broadcast %cst_28 : f32 to vector<8x128xf32>
    %80 = arith.mulf %79, %78 : vector<8x128xf32>
    %81 = arith.maximumf %78, %80 : vector<8x128xf32>
    %c16_29 = arith.constant 16 : index
    %c0_30 = arith.constant 0 : index
    %82 = vector.load %arg1[%c16_29, %c0_30] : memref<96x48xf32, #tpu.memory_space<vmem>>, vector<8x48xf32>
    %c1_i32_31 = arith.constant 1 : i32
    %83 = tpu.dynamic_rotate %81 by %c1_i32_31 dim 1 : vector<8x128xf32>, i32 -> vector<8x128xf32>
    %84 = vector.broadcast %0 : vector<1x128xf32> to vector<8x128xf32>
    %85 = arith.mulf %83, %84 : vector<8x128xf32>
    %c127_i32_32 = arith.constant 127 : i32
    %86 = tpu.dynamic_rotate %81 by %c127_i32_32 dim 1 : vector<8x128xf32>, i32 -> vector<8x128xf32>
    %87 = vector.broadcast %1 : vector<1x128xf32> to vector<8x128xf32>
    %88 = arith.mulf %86, %87 : vector<8x128xf32>
    %89 = tpu.concatenate %85, %81, %88, %3 in 0 : vector<8x128xf32>, vector<8x128xf32>, vector<8x128xf32>, vector<24x128xf32> -> vector<48x128xf32>
    %cst_33 = arith.constant dense<0.000000e+00> : vector<8x128xf32>
    %90 = tpu.matmul %82, %89, %cst_33 {dimension_numbers = #tpu.dot_dimension_numbers<[1], [0], [0], [1], [0, 0, 1, 1], [], []>} : vector<8x48xf32>, vector<48x128xf32>, vector<8x128xf32> -> vector<8x128xf32>
    %c120 = arith.constant 120 : index
    %c0_34 = arith.constant 0 : index
    %91 = vector.load %arg2[%c120, %c0_34] : memref<344x128xf32, #tpu.memory_space<vmem>>, vector<8x128xf32>
    %92 = arith.addf %90, %91 : vector<8x128xf32>
    %c128 = arith.constant 128 : index
    %c0_35 = arith.constant 0 : index
    %93 = vector.load %arg2[%c128, %c0_35] : memref<344x128xf32, #tpu.memory_space<vmem>>, vector<8x128xf32>
    %c136 = arith.constant 136 : index
    %c0_36 = arith.constant 0 : index
    %94 = vector.load %arg2[%c136, %c0_36] : memref<344x128xf32, #tpu.memory_space<vmem>>, vector<8x128xf32>
    %95 = arith.mulf %92, %92 : vector<8x128xf32>
    %96 = tpu.concatenate %92, %95 in 0 : vector<8x128xf32>, vector<8x128xf32> -> vector<16x128xf32>
    %cst_37 = arith.constant dense<0.000000e+00> : vector<16x128xf32>
    %97 = tpu.matmul %96, %2, %cst_37 {dimension_numbers = #tpu.dot_dimension_numbers<[1], [0], [0], [1], [0, 0, 1, 1], [], []>} : vector<16x128xf32>, vector<128x128xf32>, vector<16x128xf32> -> vector<16x128xf32>
    %98 = vector.extract_strided_slice %97 {offsets = [0, 0], sizes = [8, 128], strides = [1, 1]} : vector<16x128xf32> to vector<8x128xf32>
    %99 = vector.extract_strided_slice %97 {offsets = [8, 0], sizes = [8, 128], strides = [1, 1]} : vector<16x128xf32> to vector<8x128xf32>
    %100 = arith.mulf %98, %98 : vector<8x128xf32>
    %101 = arith.subf %99, %100 : vector<8x128xf32>
    %cst_38 = arith.constant 0.000000e+00 : f32
    %102 = vector.broadcast %cst_38 : f32 to vector<8x128xf32>
    %103 = arith.maximumf %101, %102 : vector<8x128xf32>
    %104 = arith.subf %92, %98 : vector<8x128xf32>
    %cst_39 = arith.constant 9.99999974E-6 : f32
    %105 = vector.broadcast %cst_39 : f32 to vector<8x128xf32>
    %106 = arith.addf %103, %105 : vector<8x128xf32>
    %107 = math.rsqrt %106 : vector<8x128xf32>
    %108 = arith.mulf %93, %107 : vector<8x128xf32>
    %109 = arith.mulf %104, %108 : vector<8x128xf32>
    %110 = arith.addf %109, %94 : vector<8x128xf32>
    %111 = arith.addf %110, %60 : vector<8x128xf32>
    %cst_40 = arith.constant 0.00999999977 : f32
    %112 = vector.broadcast %cst_40 : f32 to vector<8x128xf32>
    %113 = arith.mulf %112, %111 : vector<8x128xf32>
    %114 = arith.maximumf %111, %113 : vector<8x128xf32>
    %c1_i32_41 = arith.constant 1 : i32
    %115 = tpu.dynamic_rotate %114 by %c1_i32_41 dim 1 : vector<8x128xf32>, i32 -> vector<8x128xf32>
    %116 = vector.broadcast %0 : vector<1x128xf32> to vector<8x128xf32>
    %117 = arith.mulf %115, %116 : vector<8x128xf32>
    %c127_i32_42 = arith.constant 127 : i32
    %118 = tpu.dynamic_rotate %114 by %c127_i32_42 dim 1 : vector<8x128xf32>, i32 -> vector<8x128xf32>
    %119 = vector.broadcast %1 : vector<1x128xf32> to vector<8x128xf32>
    %120 = arith.mulf %118, %119 : vector<8x128xf32>
    %121 = tpu.concatenate %117, %114, %120, %3 in 0 : vector<8x128xf32>, vector<8x128xf32>, vector<8x128xf32>, vector<24x128xf32> -> vector<48x128xf32>
    %c24 = arith.constant 24 : index
    %c0_43 = arith.constant 0 : index
    %122 = vector.load %arg1[%c24, %c0_43] : memref<96x48xf32, #tpu.memory_space<vmem>>, vector<16x48xf32>
    %cst_44 = arith.constant dense<0.000000e+00> : vector<16x128xf32>
    %123 = tpu.matmul %122, %121, %cst_44 {dimension_numbers = #tpu.dot_dimension_numbers<[1], [0], [0], [1], [0, 0, 1, 1], [], []>} : vector<16x48xf32>, vector<48x128xf32>, vector<16x128xf32> -> vector<16x128xf32>
    %124 = vector.extract_strided_slice %123 {offsets = [0, 0], sizes = [8, 128], strides = [1, 1]} : vector<16x128xf32> to vector<8x128xf32>
    %c152 = arith.constant 152 : index
    %c0_45 = arith.constant 0 : index
    %125 = vector.load %arg2[%c152, %c0_45] : memref<344x128xf32, #tpu.memory_space<vmem>>, vector<8x128xf32>
    %126 = arith.addf %124, %125 : vector<8x128xf32>
    %127 = vector.extract_strided_slice %123 {offsets = [8, 0], sizes = [8, 128], strides = [1, 1]} : vector<16x128xf32> to vector<8x128xf32>
    %c200 = arith.constant 200 : index
    %c0_46 = arith.constant 0 : index
    %128 = vector.load %arg2[%c200, %c0_46] : memref<344x128xf32, #tpu.memory_space<vmem>>, vector<8x128xf32>
    %129 = arith.addf %127, %128 : vector<8x128xf32>
    %c160 = arith.constant 160 : index
    %c0_47 = arith.constant 0 : index
    %130 = vector.load %arg2[%c160, %c0_47] : memref<344x128xf32, #tpu.memory_space<vmem>>, vector<8x128xf32>
    %c168 = arith.constant 168 : index
    %c0_48 = arith.constant 0 : index
    %131 = vector.load %arg2[%c168, %c0_48] : memref<344x128xf32, #tpu.memory_space<vmem>>, vector<8x128xf32>
    %132 = arith.mulf %126, %126 : vector<8x128xf32>
    %133 = tpu.concatenate %126, %132 in 0 : vector<8x128xf32>, vector<8x128xf32> -> vector<16x128xf32>
    %cst_49 = arith.constant dense<0.000000e+00> : vector<16x128xf32>
    %134 = tpu.matmul %133, %2, %cst_49 {dimension_numbers = #tpu.dot_dimension_numbers<[1], [0], [0], [1], [0, 0, 1, 1], [], []>} : vector<16x128xf32>, vector<128x128xf32>, vector<16x128xf32> -> vector<16x128xf32>
    %135 = vector.extract_strided_slice %134 {offsets = [0, 0], sizes = [8, 128], strides = [1, 1]} : vector<16x128xf32> to vector<8x128xf32>
    %136 = vector.extract_strided_slice %134 {offsets = [8, 0], sizes = [8, 128], strides = [1, 1]} : vector<16x128xf32> to vector<8x128xf32>
    %137 = arith.mulf %135, %135 : vector<8x128xf32>
    %138 = arith.subf %136, %137 : vector<8x128xf32>
    %cst_50 = arith.constant 0.000000e+00 : f32
    %139 = vector.broadcast %cst_50 : f32 to vector<8x128xf32>
    %140 = arith.maximumf %138, %139 : vector<8x128xf32>
    %141 = arith.subf %126, %135 : vector<8x128xf32>
    %cst_51 = arith.constant 9.99999974E-6 : f32
    %142 = vector.broadcast %cst_51 : f32 to vector<8x128xf32>
    %143 = arith.addf %140, %142 : vector<8x128xf32>
    %144 = math.rsqrt %143 : vector<8x128xf32>
    %145 = arith.mulf %130, %144 : vector<8x128xf32>
    %146 = arith.mulf %141, %145 : vector<8x128xf32>
    %147 = arith.addf %146, %131 : vector<8x128xf32>
    %cst_52 = arith.constant 0.00999999977 : f32
    %148 = vector.broadcast %cst_52 : f32 to vector<8x128xf32>
    %149 = arith.mulf %148, %147 : vector<8x128xf32>
    %150 = arith.maximumf %147, %149 : vector<8x128xf32>
    %c40 = arith.constant 40 : index
    %c0_53 = arith.constant 0 : index
    %151 = vector.load %arg1[%c40, %c0_53] : memref<96x48xf32, #tpu.memory_space<vmem>>, vector<8x48xf32>
    %c1_i32_54 = arith.constant 1 : i32
    %152 = tpu.dynamic_rotate %150 by %c1_i32_54 dim 1 : vector<8x128xf32>, i32 -> vector<8x128xf32>
    %153 = vector.broadcast %0 : vector<1x128xf32> to vector<8x128xf32>
    %154 = arith.mulf %152, %153 : vector<8x128xf32>
    %c127_i32_55 = arith.constant 127 : i32
    %155 = tpu.dynamic_rotate %150 by %c127_i32_55 dim 1 : vector<8x128xf32>, i32 -> vector<8x128xf32>
    %156 = vector.broadcast %1 : vector<1x128xf32> to vector<8x128xf32>
    %157 = arith.mulf %155, %156 : vector<8x128xf32>
    %158 = tpu.concatenate %154, %150, %157, %3 in 0 : vector<8x128xf32>, vector<8x128xf32>, vector<8x128xf32>, vector<24x128xf32> -> vector<48x128xf32>
    %cst_56 = arith.constant dense<0.000000e+00> : vector<8x128xf32>
    %159 = tpu.matmul %151, %158, %cst_56 {dimension_numbers = #tpu.dot_dimension_numbers<[1], [0], [0], [1], [0, 0, 1, 1], [], []>} : vector<8x48xf32>, vector<48x128xf32>, vector<8x128xf32> -> vector<8x128xf32>
    %c176 = arith.constant 176 : index
    %c0_57 = arith.constant 0 : index
    %160 = vector.load %arg2[%c176, %c0_57] : memref<344x128xf32, #tpu.memory_space<vmem>>, vector<8x128xf32>
    %161 = arith.addf %159, %160 : vector<8x128xf32>
    %c184 = arith.constant 184 : index
    %c0_58 = arith.constant 0 : index
    %162 = vector.load %arg2[%c184, %c0_58] : memref<344x128xf32, #tpu.memory_space<vmem>>, vector<8x128xf32>
    %c192 = arith.constant 192 : index
    %c0_59 = arith.constant 0 : index
    %163 = vector.load %arg2[%c192, %c0_59] : memref<344x128xf32, #tpu.memory_space<vmem>>, vector<8x128xf32>
    %164 = arith.mulf %161, %161 : vector<8x128xf32>
    %165 = tpu.concatenate %161, %164 in 0 : vector<8x128xf32>, vector<8x128xf32> -> vector<16x128xf32>
    %cst_60 = arith.constant dense<0.000000e+00> : vector<16x128xf32>
    %166 = tpu.matmul %165, %2, %cst_60 {dimension_numbers = #tpu.dot_dimension_numbers<[1], [0], [0], [1], [0, 0, 1, 1], [], []>} : vector<16x128xf32>, vector<128x128xf32>, vector<16x128xf32> -> vector<16x128xf32>
    %167 = vector.extract_strided_slice %166 {offsets = [0, 0], sizes = [8, 128], strides = [1, 1]} : vector<16x128xf32> to vector<8x128xf32>
    %168 = vector.extract_strided_slice %166 {offsets = [8, 0], sizes = [8, 128], strides = [1, 1]} : vector<16x128xf32> to vector<8x128xf32>
    %169 = arith.mulf %167, %167 : vector<8x128xf32>
    %170 = arith.subf %168, %169 : vector<8x128xf32>
    %cst_61 = arith.constant 0.000000e+00 : f32
    %171 = vector.broadcast %cst_61 : f32 to vector<8x128xf32>
    %172 = arith.maximumf %170, %171 : vector<8x128xf32>
    %173 = arith.subf %161, %167 : vector<8x128xf32>
    %cst_62 = arith.constant 9.99999974E-6 : f32
    %174 = vector.broadcast %cst_62 : f32 to vector<8x128xf32>
    %175 = arith.addf %172, %174 : vector<8x128xf32>
    %176 = math.rsqrt %175 : vector<8x128xf32>
    %177 = arith.mulf %162, %176 : vector<8x128xf32>
    %178 = arith.mulf %173, %177 : vector<8x128xf32>
    %179 = arith.addf %178, %163 : vector<8x128xf32>
    %180 = arith.addf %179, %129 : vector<8x128xf32>
    %cst_63 = arith.constant 0.00999999977 : f32
    %181 = vector.broadcast %cst_63 : f32 to vector<8x128xf32>
    %182 = arith.mulf %181, %180 : vector<8x128xf32>
    %183 = arith.maximumf %180, %182 : vector<8x128xf32>
    %c1_i32_64 = arith.constant 1 : i32
    %184 = tpu.dynamic_rotate %183 by %c1_i32_64 dim 1 : vector<8x128xf32>, i32 -> vector<8x128xf32>
    %185 = vector.broadcast %0 : vector<1x128xf32> to vector<8x128xf32>
    %186 = arith.mulf %184, %185 : vector<8x128xf32>
    %c127_i32_65 = arith.constant 127 : i32
    %187 = tpu.dynamic_rotate %183 by %c127_i32_65 dim 1 : vector<8x128xf32>, i32 -> vector<8x128xf32>
    %188 = vector.broadcast %1 : vector<1x128xf32> to vector<8x128xf32>
    %189 = arith.mulf %187, %188 : vector<8x128xf32>
    %190 = tpu.concatenate %186, %183, %189, %3 in 0 : vector<8x128xf32>, vector<8x128xf32>, vector<8x128xf32>, vector<24x128xf32> -> vector<48x128xf32>
    %c48_66 = arith.constant 48 : index
    %c0_67 = arith.constant 0 : index
    %191 = vector.load %arg1[%c48_66, %c0_67] : memref<96x48xf32, #tpu.memory_space<vmem>>, vector<24x48xf32>
    %cst_68 = arith.constant dense<0.000000e+00> : vector<24x128xf32>
    %192 = tpu.matmul %191, %190, %cst_68 {dimension_numbers = #tpu.dot_dimension_numbers<[1], [0], [0], [1], [0, 0, 1, 1], [], []>} : vector<24x48xf32>, vector<48x128xf32>, vector<24x128xf32> -> vector<24x128xf32>
    %193 = vector.extract_strided_slice %192 {offsets = [0, 0], sizes = [8, 128], strides = [1, 1]} : vector<24x128xf32> to vector<8x128xf32>
    %c208 = arith.constant 208 : index
    %c0_69 = arith.constant 0 : index
    %194 = vector.load %arg2[%c208, %c0_69] : memref<344x128xf32, #tpu.memory_space<vmem>>, vector<8x128xf32>
    %195 = arith.addf %193, %194 : vector<8x128xf32>
    %196 = vector.extract_strided_slice %192 {offsets = [8, 0], sizes = [16, 128], strides = [1, 1]} : vector<24x128xf32> to vector<16x128xf32>
    %c280 = arith.constant 280 : index
    %c0_70 = arith.constant 0 : index
    %197 = vector.load %arg2[%c280, %c0_70] : memref<344x128xf32, #tpu.memory_space<vmem>>, vector<16x128xf32>
    %198 = arith.addf %196, %197 : vector<16x128xf32>
    %c216 = arith.constant 216 : index
    %c0_71 = arith.constant 0 : index
    %199 = vector.load %arg2[%c216, %c0_71] : memref<344x128xf32, #tpu.memory_space<vmem>>, vector<8x128xf32>
    %c224 = arith.constant 224 : index
    %c0_72 = arith.constant 0 : index
    %200 = vector.load %arg2[%c224, %c0_72] : memref<344x128xf32, #tpu.memory_space<vmem>>, vector<8x128xf32>
    %201 = arith.mulf %195, %195 : vector<8x128xf32>
    %202 = tpu.concatenate %195, %201 in 0 : vector<8x128xf32>, vector<8x128xf32> -> vector<16x128xf32>
    %cst_73 = arith.constant dense<0.000000e+00> : vector<16x128xf32>
    %203 = tpu.matmul %202, %2, %cst_73 {dimension_numbers = #tpu.dot_dimension_numbers<[1], [0], [0], [1], [0, 0, 1, 1], [], []>} : vector<16x128xf32>, vector<128x128xf32>, vector<16x128xf32> -> vector<16x128xf32>
    %204 = vector.extract_strided_slice %203 {offsets = [0, 0], sizes = [8, 128], strides = [1, 1]} : vector<16x128xf32> to vector<8x128xf32>
    %205 = vector.extract_strided_slice %203 {offsets = [8, 0], sizes = [8, 128], strides = [1, 1]} : vector<16x128xf32> to vector<8x128xf32>
    %206 = arith.mulf %204, %204 : vector<8x128xf32>
    %207 = arith.subf %205, %206 : vector<8x128xf32>
    %cst_74 = arith.constant 0.000000e+00 : f32
    %208 = vector.broadcast %cst_74 : f32 to vector<8x128xf32>
    %209 = arith.maximumf %207, %208 : vector<8x128xf32>
    %210 = arith.subf %195, %204 : vector<8x128xf32>
    %cst_75 = arith.constant 9.99999974E-6 : f32
    %211 = vector.broadcast %cst_75 : f32 to vector<8x128xf32>
    %212 = arith.addf %209, %211 : vector<8x128xf32>
    %213 = math.rsqrt %212 : vector<8x128xf32>
    %214 = arith.mulf %199, %213 : vector<8x128xf32>
    %215 = arith.mulf %210, %214 : vector<8x128xf32>
    %216 = arith.addf %215, %200 : vector<8x128xf32>
    %cst_76 = arith.constant 0.00999999977 : f32
    %217 = vector.broadcast %cst_76 : f32 to vector<8x128xf32>
    %218 = arith.mulf %217, %216 : vector<8x128xf32>
    %219 = arith.maximumf %216, %218 : vector<8x128xf32>
    %c72 = arith.constant 72 : index
    %c0_77 = arith.constant 0 : index
    %220 = vector.load %arg1[%c72, %c0_77] : memref<96x48xf32, #tpu.memory_space<vmem>>, vector<16x48xf32>
    %c1_i32_78 = arith.constant 1 : i32
    %221 = tpu.dynamic_rotate %219 by %c1_i32_78 dim 1 : vector<8x128xf32>, i32 -> vector<8x128xf32>
    %222 = vector.broadcast %0 : vector<1x128xf32> to vector<8x128xf32>
    %223 = arith.mulf %221, %222 : vector<8x128xf32>
    %c127_i32_79 = arith.constant 127 : i32
    %224 = tpu.dynamic_rotate %219 by %c127_i32_79 dim 1 : vector<8x128xf32>, i32 -> vector<8x128xf32>
    %225 = vector.broadcast %1 : vector<1x128xf32> to vector<8x128xf32>
    %226 = arith.mulf %224, %225 : vector<8x128xf32>
    %227 = tpu.concatenate %223, %219, %226, %3 in 0 : vector<8x128xf32>, vector<8x128xf32>, vector<8x128xf32>, vector<24x128xf32> -> vector<48x128xf32>
    %cst_80 = arith.constant dense<0.000000e+00> : vector<16x128xf32>
    %228 = tpu.matmul %220, %227, %cst_80 {dimension_numbers = #tpu.dot_dimension_numbers<[1], [0], [0], [1], [0, 0, 1, 1], [], []>} : vector<16x48xf32>, vector<48x128xf32>, vector<16x128xf32> -> vector<16x128xf32>
    %c232 = arith.constant 232 : index
    %c0_81 = arith.constant 0 : index
    %229 = vector.load %arg2[%c232, %c0_81] : memref<344x128xf32, #tpu.memory_space<vmem>>, vector<16x128xf32>
    %230 = arith.addf %228, %229 : vector<16x128xf32>
    %c248 = arith.constant 248 : index
    %c0_82 = arith.constant 0 : index
    %231 = vector.load %arg2[%c248, %c0_82] : memref<344x128xf32, #tpu.memory_space<vmem>>, vector<16x128xf32>
    %c264 = arith.constant 264 : index
    %c0_83 = arith.constant 0 : index
    %232 = vector.load %arg2[%c264, %c0_83] : memref<344x128xf32, #tpu.memory_space<vmem>>, vector<16x128xf32>
    %233 = arith.mulf %230, %230 : vector<16x128xf32>
    %234 = tpu.concatenate %230, %233 in 0 : vector<16x128xf32>, vector<16x128xf32> -> vector<32x128xf32>
    %cst_84 = arith.constant dense<0.000000e+00> : vector<32x128xf32>
    %235 = tpu.matmul %234, %2, %cst_84 {dimension_numbers = #tpu.dot_dimension_numbers<[1], [0], [0], [1], [0, 0, 1, 1], [], []>} : vector<32x128xf32>, vector<128x128xf32>, vector<32x128xf32> -> vector<32x128xf32>
    %236 = vector.extract_strided_slice %235 {offsets = [0, 0], sizes = [16, 128], strides = [1, 1]} : vector<32x128xf32> to vector<16x128xf32>
    %237 = vector.extract_strided_slice %235 {offsets = [16, 0], sizes = [16, 128], strides = [1, 1]} : vector<32x128xf32> to vector<16x128xf32>
    %238 = arith.mulf %236, %236 : vector<16x128xf32>
    %239 = arith.subf %237, %238 : vector<16x128xf32>
    %cst_85 = arith.constant 0.000000e+00 : f32
    %240 = vector.broadcast %cst_85 : f32 to vector<16x128xf32>
    %241 = arith.maximumf %239, %240 : vector<16x128xf32>
    %242 = arith.subf %230, %236 : vector<16x128xf32>
    %cst_86 = arith.constant 9.99999974E-6 : f32
    %243 = vector.broadcast %cst_86 : f32 to vector<16x128xf32>
    %244 = arith.addf %241, %243 : vector<16x128xf32>
    %245 = math.rsqrt %244 : vector<16x128xf32>
    %246 = arith.mulf %231, %245 : vector<16x128xf32>
    %247 = arith.mulf %242, %246 : vector<16x128xf32>
    %248 = arith.addf %247, %232 : vector<16x128xf32>
    %249 = arith.addf %248, %198 : vector<16x128xf32>
    %cst_87 = arith.constant 0.00999999977 : f32
    %250 = vector.broadcast %cst_87 : f32 to vector<16x128xf32>
    %251 = arith.mulf %250, %249 : vector<16x128xf32>
    %252 = arith.maximumf %249, %251 : vector<16x128xf32>
    %c88 = arith.constant 88 : index
    %c0_88 = arith.constant 0 : index
    %253 = vector.load %arg1[%c88, %c0_88] : memref<96x48xf32, #tpu.memory_space<vmem>>, vector<8x48xf32>
    %c1_i32_89 = arith.constant 1 : i32
    %254 = tpu.dynamic_rotate %252 by %c1_i32_89 dim 1 : vector<16x128xf32>, i32 -> vector<16x128xf32>
    %255 = vector.broadcast %0 : vector<1x128xf32> to vector<16x128xf32>
    %256 = arith.mulf %254, %255 : vector<16x128xf32>
    %c127_i32_90 = arith.constant 127 : i32
    %257 = tpu.dynamic_rotate %252 by %c127_i32_90 dim 1 : vector<16x128xf32>, i32 -> vector<16x128xf32>
    %258 = vector.broadcast %1 : vector<1x128xf32> to vector<16x128xf32>
    %259 = arith.mulf %257, %258 : vector<16x128xf32>
    %260 = tpu.concatenate %256, %252, %259 in 0 : vector<16x128xf32>, vector<16x128xf32>, vector<16x128xf32> -> vector<48x128xf32>
    %cst_91 = arith.constant dense<0.000000e+00> : vector<8x128xf32>
    %261 = tpu.matmul %253, %260, %cst_91 {dimension_numbers = #tpu.dot_dimension_numbers<[1], [0], [0], [1], [0, 0, 1, 1], [], []>} : vector<8x48xf32>, vector<48x128xf32>, vector<8x128xf32> -> vector<8x128xf32>
    %262 = vector.extract_strided_slice %261 {offsets = [0, 0], sizes = [1, 128], strides = [1, 1]} : vector<8x128xf32> to vector<1x128xf32>
    %c296 = arith.constant 296 : index
    %c0_92 = arith.constant 0 : index
    %263 = vector.load %arg2[%c296, %c0_92] : memref<344x128xf32, #tpu.memory_space<vmem>>, vector<1x128xf32>
    %264 = arith.addf %262, %263 : vector<1x128xf32>
    %c328 = arith.constant 328 : index
    %c0_93 = arith.constant 0 : index
    %265 = vector.load %arg2[%c328, %c0_93] : memref<344x128xf32, #tpu.memory_space<vmem>>, vector<8x128xf32>
    %266 = vector.broadcast %264 : vector<1x128xf32> to vector<8x128xf32>
    %267 = arith.mulf %265, %266 : vector<8x128xf32>
    %c0_94 = arith.constant 0 : index
    %c0_95 = arith.constant 0 : index
    %268 = vector.load %arg3[%c0_94, %c0_95] : memref<128x128xf32, #tpu.memory_space<vmem>>, vector<128x128xf32>
    %cst_96 = arith.constant dense<0.000000e+00> : vector<8x128xf32>
    %269 = tpu.matmul %267, %268, %cst_96 {dimension_numbers = #tpu.dot_dimension_numbers<[1], [0], [0], [1], [0, 0, 1, 1], [], []>} : vector<8x128xf32>, vector<128x128xf32>, vector<8x128xf32> -> vector<8x128xf32>
    %c304 = arith.constant 304 : index
    %c0_97 = arith.constant 0 : index
    %270 = vector.load %arg2[%c304, %c0_97] : memref<344x128xf32, #tpu.memory_space<vmem>>, vector<1x128xf32>
    %271 = vector.broadcast %270 : vector<1x128xf32> to vector<8x128xf32>
    %272 = arith.addf %269, %271 : vector<8x128xf32>
    %c0_98 = arith.constant 0 : index
    %c0_99 = arith.constant 0 : index
    %273 = vector.load %arg5[%c0_98, %c0_99] : memref<8x128xf32, #tpu.memory_space<vmem>>, vector<8x128xf32>
    tpu.vector_store %arg5[%c0_98, %c0_99], %272 {strides = array<i32>} : memref<8x128xf32, #tpu.memory_space<vmem>>, vector<8x128xf32>,
    return
  }
}

</mosaic_0001>

<bundles_post_ra>
// kernel: resnet_forward.1
= control target key start
LH: loop header
LB: loop body
LE: loop exit
PB: predicated region body
PF: predicated region fallthrough
CT: control target
= control target key end

     0   :  { %10 = vsyncpa [#allocation3], 0  ;;  %s1250_s0 = inlined_call_operand.vmem [shape: f32[8,128], index: 0, kind: input, shape index: {}]   ;;  %s1251_s1 = inlined_call_operand.vmem [shape: f32[96,48], index: 1, kind: input, shape index: {}]   ;;  %s1252_s2 = inlined_call_operand.hbm [shape: f32[344,128], index: 2, kind: input, shape index: {}]   ;;  %s1253_s3 = inlined_call_operand.vmem [shape: f32[128,128], index: 3, kind: input, shape index: {}]   ;;  %s1254_s4 = inlined_call_operand.hbm [shape: f32[128,128], index: 4, kind: input, shape index: {}]   ;;  %s1255_s5 = inlined_call_operand.vmem [shape: f32[8,128], index: 5, kind: output, shape index: {}]  }
   0x1   :  { %s20_s20 = sshll.u32 %s1252_s2, 4  ;;  %s21_s20 = int_to_ptr.hbm [resolvable:$true] %s20_s20 }
   0x2   :  { %11 = vsyncpa [#allocation5], 0  ;;  %s906_s21 = smov [#allocation2]   ;;  %s35_s25 = sshll.u32 %s1254_s4, 4  ;;  %s36_s25 = int_to_ptr.hbm [resolvable:$true] %s35_s25 }
   0x3   :  { %s22_s22 = sshll.u32 %s906_s21, 4  ;;  %s907_s26 = smov 128   ;;  %s23_s22 = int_to_ptr.vmem [resolvable:$true] %s22_s22 }
   0x4   :  { %s908_s27 = smov 8   ;;  %s909_s28 = smov [#allocation4]  }
   0x5   :  { %28 = dma.hbm_to_vmem [thread:$0]  %s21_s20, 5504, %s23_s22, [#allocation3], %s907_s26, %s907_s26, %s908_s27  }
   0x6   :  { %s37_s29 = sshll.u32 %s909_s28, 4  ;;  %s38_s29 = int_to_ptr.vmem [resolvable:$true] %s37_s29 }
   0x7   :  { %43 = dma.hbm_to_vmem [thread:$0]  %s36_s25, 2048, %s38_s29, [#allocation5], %s907_s26, %s907_s26, %s908_s27  }
   0x8   :  { %902 = dma.done.wait [#allocation3], 5504  }
   0x9   :  { %903 = vsyncadd [#allocation3], 4294961792 }
   0xa   :  { %904 = dma.done.wait [#allocation5], 2048  }
   0xb   :  { %905 = vsyncadd [#allocation5], 4294965248  ;;  %v951_v0 = vld [vmem:[%s1250_s0] sm:$0xff]  ;;  %s910_s6 = smov 1   ;;  %v955_v1 = vld [vmem:[#allocation4 + $0x78] sm:$0xff]  ;;  %s911_s0 = smov 127  }
   0xc   :  { %71 = vrot.lane.b32.xlu0 %v951_v0, %s910_s6  ;;  %v957_v2 = vld [vmem:[#allocation4 + $0x70] sm:$0xff]  ;;  %110 = vmatpush.msra.mxu0 %v955_v1  ;;  %v960_v3 = vld [vmem:[#allocation4 + $0x68] sm:$0xff]  ;;  %v963_v4 = vld [vmem:[#allocation4 + $0x60] sm:$0xff]  ;;  %v84_v20 = vperm.slane %v951_v0, 0  ;;  %vm191_vm6 = vcmask 392192  }
   0xd   :  { %v969_v5 = vld [vmem:[#allocation4 + $0x58] sm:$0xff]  ;;  %v972_v6 = vld [vmem:[#allocation4 + $0x50] sm:$0xff]  ;;  %v975_v7 = vld [vmem:[#allocation4 + $0x48] sm:$0xff] }
   0xe   :  { %111 = vmatpush.msra.mxu0 %v957_v2  ;;  %v978_v8 = vld [vmem:[#allocation4 + $0x40] sm:$0xff]  ;;  %v981_v9 = vld [vmem:[#allocation4 + $0x38] sm:$0xff]  ;;  %v984_v10 = vld [vmem:[#allocation4 + $0x30] sm:$0xff] }
   0xf   :  { %v987_v11 = vld [vmem:[#allocation4 + $0x28] sm:$0xff]  ;;  %v990_v12 = vld [vmem:[#allocation4 + $0x20] sm:$0xff]  ;;  %v993_v13 = vld [vmem:[#allocation4 + $0x18] sm:$0xff] }
  0x10   :  { %112 = vmatpush.msra.mxu0 %v960_v3  ;;  %v995_v14 = vld [vmem:[#allocation4 + $0x10] sm:$0xff]  ;;  %v998_v15 = vld [vmem:[#allocation4 + $0x8] sm:$0xff]  ;;  %v1001_v16 = vld [vmem:[#allocation4] sm:$0xff] }
  0x11   :  { %v52_v17 = vld [vmem:[#allocation2 + $0x138] sm:$0x1]  ;;  %v82_v22 = vld [vmem:[#allocation2 + $0x10] sm:$0xff]  ;;  %v77_v23 = vld [vmem:[#allocation2] sm:$0xff] }
  0x12   :  { %113 = vmatpush.msra.mxu0 %v963_v4  ;;  %v53_v24 = vld [vmem:[#allocation2 + $0x140] sm:$0x1]  ;;  %v83_v25 = vld [vmem:[#allocation2 + $0x18] sm:$0xff]  ;;  %v78_v26 = vld [vmem:[#allocation2 + $0x8] sm:$0xff]  ;;  %v85_v28 = vmul.f32 %v84_v20, %v82_v22 }
  0x13   :  { %v89_v31 = vld [vmem:[#allocation2 + $0x20] sm:$0xff]  ;;  %v90_v32 = vld [vmem:[#allocation2 + $0x28] sm:$0xff]  ;;  %v86_v33 = vmul.f32 %v84_v20, %v83_v25  ;;  %v96_v39 = vld [vmem:[#allocation2 + $0x30] sm:$0xff] }
  0x14   :  { %74 = vrot.lane.b32.xlu0 %v951_v0, %s911_s0  ;;  %114 = vmatpush.msra.mxu0 %v969_v5  ;;  %v97_v44 = vld [vmem:[#allocation2 + $0x38] sm:$0xff] }
  0x16   :  { %115 = vmatpush.msra.mxu0 %v972_v6 }
  0x18   :  { %116 = vmatpush.msra.mxu0 %v975_v7 }
  0x1a   :  { %117 = vmatpush.msra.mxu0 %v978_v8 }
  0x1c   :  { %118 = vmatpush.msra.mxu0 %v981_v9 }
  0x1e   :  { %119 = vmatpush.msra.mxu0 %v984_v10 }
  0x20   :  { %120 = vmatpush.msra.mxu0 %v987_v11 }
  0x22   :  { %121 = vmatpush.msra.mxu0 %v990_v12 }
  0x24   :  { %122 = vmatpush.msra.mxu0 %v993_v13 }
  0x26   :  { %123 = vmatpush.msra.mxu0 %v995_v14 }
  0x28   :  { %124 = vmatpush.msra.mxu0 %v998_v15 }
  0x2a   :  { %125 = vmatpush.msra.mxu0 %v1001_v16 }
  0x2c   :  { %470 = vmatpush.msrb.mxu0 %v955_v1 }
  0x2e   :  { %471 = vmatpush.msrb.mxu0 %v957_v2 }
  0x30   :  { %472 = vmatpush.msrb.mxu0 %v960_v3 }
  0x32   :  { %473 = vmatpush.msrb.mxu0 %v963_v4 }
  0x34   :  { %474 = vmatpush.msrb.mxu0 %v969_v5 }
  0x36   :  { %475 = vmatpush.msrb.mxu0 %v972_v6 }
  0x38   :  { %476 = vmatpush.msrb.mxu0 %v975_v7 }
  0x3a   :  { %477 = vmatpush.msrb.mxu0 %v978_v8 }
  0x3c   :  { %478 = vmatpush.msrb.mxu0 %v981_v9 }
  0x3e   :  { %479 = vmatpush.msrb.mxu0 %v984_v10 }
  0x40   :  { %480 = vmatpush.msrb.mxu0 %v987_v11 }
  0x42   :  { %481 = vmatpush.msrb.mxu0 %v990_v12 }
  0x44   :  { %482 = vmatpush.msrb.mxu0 %v993_v13 }
  0x46   :  { %483 = vmatpush.msrb.mxu0 %v995_v14 }
  0x48   :  { %484 = vmatpush.msrb.mxu0 %v998_v15 }
  0x4a   :  { %485 = vmatpush.msrb.mxu0 %v1001_v16 }
  0x7e   :  { %v72_v18 = vpop.permute.xlu0 %71 }
  0x7f   :  { %v73_v19 = vmul.f32 %v72_v18, %v52_v17 }
  0x81   :  { %v79_v21 = vperm.slane %v73_v19, 0 }
  0x83   :  { %v80_v29 = vmul.f32 %v79_v21, %v77_v23  ;;  %v81_v34 = vmul.f32 %v79_v21, %v78_v26 }
  0x85   :  { %v87_v36 = vadd.f32 %v85_v28, %v80_v29  ;;  %v88_v40 = vadd.f32 %v86_v33, %v81_v34  ;;  %v105_v28 = vld [vmem:[#allocation2 + $0x48] sm:$0xff]  ;;  %v104_v33 = vld [vmem:[#allocation2 + $0x40] sm:$0xff] }
  0x86   :  { %v75_v27 = vpop.permute.xlu0 %74 }
  0x87   :  { %v76_v30 = vmul.f32 %v75_v27, %v53_v24 }
  0x89   :  { %v91_v35 = vperm.slane %v76_v30, 0 }
  0x8b   :  { %v92_v37 = vmul.f32 %v91_v35, %v89_v31  ;;  %v93_v38 = vmul.f32 %v91_v35, %v90_v32  ;;  %v107_v32 = vld [vmem:[#allocation2 + $0x58] sm:$0xff] }
  0x8d   :  { %v94_v41 = vadd.f32 %v92_v37, %v87_v36  ;;  %v95_v42 = vadd.f32 %v93_v38, %v88_v40  ;;  %v106_v40 = vld [vmem:[#allocation2 + $0x50] sm:$0xff] }
  0x8f   :  { %v98_v43 = vadd.f32 %v96_v39, %v94_v41  ;;  %v99_v47 = vadd.f32 %v97_v44, %v95_v42  ;;  %v1026_v42 = vld [vmem:[#allocation2 + $0x140] ss:$0 sm:$0xff] }
  0x91   :  { %v100_v45 = vmul.f32 0.01, %v98_v43  ;;  %v101_v48 = vmul.f32 0.01, %v99_v47 }
  0x93   :  { %v102_v46 = vmax.f32 %v98_v43, %v100_v45  ;;  %v103_v49 = vmax.f32 %v99_v47, %v101_v48  ;;  %v1030_v48 = vld [vmem:[#allocation2 + $0x138] ss:$0 sm:$0xff] }
  0x95   :  { %126 = vmatmul.f32.vlgmr.msra.gmra.mxu0 %v102_v46  ;;  %v108_v50 = vmul.f32 %v102_v46, %v102_v46  ;;  %v109_v51 = vmul.f32 %v103_v49, %v103_v49 }
  0x9d   :  { %129 = vmatmul.f32.gmra.mxu0 %v103_v49 }
  0xa5   :  { %132 = vmatmul.f32.gmra.mxu0 %v108_v50 }
  0xad   :  { %135 = vmatmul.f32.gmra.mxu0 %v109_v51 }
 0x112   :  { %v127_v52 = vpop.f32.mrf.mxu0 }
 0x113   :  { %v139_v54 = vmul.f32 %v127_v52, %v127_v52  ;;  %v145_v38 = vsub.f32 %v102_v46, %v127_v52  ;;  %v189_v52 = vld [vmem:[%s1251_s1] sm:$0xff] }
 0x11a   :  { %v130_v53 = vpop.f32.mrf.mxu0 }
 0x11b   :  { %v140_v59 = vmul.f32 %v130_v53, %v130_v53  ;;  %v146_v30 = vsub.f32 %v103_v49, %v130_v53  ;;  %v190_v53 = vld [vmem:[%s1251_s1 + $0x8] sm:$0xff] }
 0x122   :  { %v133_v55 = vpop.f32.mrf.mxu0 }
 0x123   :  { %v141_v56 = vsub.f32 %v133_v55, %v139_v54  ;;  %v221_v54 = vld [vmem:[#allocation2 + $0x60] sm:$0xff] }
 0x125   :  { %v143_v57 = vmax.f32 %v141_v56, 0.0 }
 0x127   :  { %v147_v58 = vadd.f32 1e-05, %v143_v57 }
 0x129   :  { %836 = vrsqrt.f32 %v147_v58  ;;  %vm155_vm4 = vweird.f32 %v147_v58 }
 0x12a   :  { %v136_v60 = vpop.f32.mrf.mxu0 }
 0x12b   :  { %v142_v61 = vsub.f32 %v136_v60, %v140_v59 }
 0x12d   :  { %v144_v62 = vmax.f32 %v142_v61, 0.0 }
 0x12f   :  { %v837_v63 = vpop.eup %836  ;;  %v148_v0 = vadd.f32 1e-05, %v144_v62 }
 0x130   :  { %v150_v17 = vmul.f32 %v837_v63, %v147_v58  ;;  %vm156_vm1 = vweird.f32 %v837_v63 }
 0x131   :  { %838 = vrsqrt.f32 %v148_v0  ;;  %vm165_vm2 = vweird.f32 %v148_v0  ;;  %vm157_vm5 = vmor %vm155_vm4, %vm156_vm1 }
 0x132   :  { %v151_v18 = vmul.f32 %v837_v63, %v150_v17 }
 0x134   :  { %v152_v20 = vmul.f32 0.5, %v151_v18 }
 0x136   :  { %v153_v23 = vsub.f32 1.5, %v152_v20 }
 0x137   :  { %v839_v19 = vpop.eup %838 }
 0x138   :  { %v160_v21 = vmul.f32 %v839_v19, %v148_v0  ;;  %vm166_vm0 = vweird.f32 %v839_v19  ;;  %v154_v26 = vmul.f32 %v837_v63, %v153_v23  ;;  %v225_v23 = vld [vmem:[#allocation2 + $0x68] sm:$0xff] }
 0x139   :  { %vm167_vm3 = vmor %vm165_vm2, %vm166_vm0 }
 0x13a   :  { %v161_v22 = vmul.f32 %v839_v19, %v160_v21  ;;  %v158_v34 = vsel %vm157_vm5, %v837_v63, %v154_v26 }
 0x13b   :  { %v169_v37 = vmul.f32 %v158_v34, %v104_v33 }
 0x13c   :  { %v162_v24 = vmul.f32 0.5, %v161_v22 }
 0x13d   :  { %v171_v39 = vmul.f32 %v169_v37, %v145_v38  ;;  %v278_v37 = vld [vmem:[#allocation2 + $0x78] sm:$0xff] }
 0x13e   :  { %v163_v25 = vsub.f32 1.5, %v162_v24 }
 0x13f   :  { %v173_v41 = vadd.f32 %v171_v39, %v106_v40 }
 0x140   :  { %v164_v27 = vmul.f32 %v839_v19, %v163_v25 }
 0x142   :  { %v168_v29 = vsel %vm167_vm3, %v839_v19, %v164_v27  ;;  %v226_v27 = vld [vmem:[#allocation2 + $0x70] sm:$0xff] }
 0x143   :  { %v170_v31 = vmul.f32 %v168_v29, %v105_v28 }
 0x145   :  { %v172_v35 = vmul.f32 %v170_v31, %v146_v30 }
 0x147   :  { %v174_v36 = vadd.f32 %v172_v35, %v107_v32 }
 0x149   :  { %177 = vrot.lane.b32.xlu2 %v174_v36, %s910_s6  ;;  %184 = vrot.lane.b32.xlu1 %v174_v36, %s911_s0 }
 0x151   :  { %175 = vrot.lane.b32.xlu2 %v173_v41, %s910_s6  ;;  %182 = vrot.lane.b32.xlu1 %v173_v41, %s911_s0 }
 0x1a3   :  { %v178_v45 = vpop.permute.xlu2 %177 }
 0x1a4   :  { %v181_v50 = vmul.f32 %v1030_v48, %v178_v45 }
 0x1ab   :  { %v176_v49 = vpop.permute.xlu2 %175 }
 0x1ac   :  { %v180_v51 = vmul.f32 %v1030_v48, %v176_v49 }
 0x1bb   :  { %v185_v43 = vpop.permute.xlu1 %184 }
 0x1bc   :  { %v188_v44 = vmul.f32 %v1026_v42, %v185_v43 }
 0x1be   :  { %208 = vmatpush.msra.mxu2 %v188_v44 }
 0x1c3   :  { %v183_v47 = vpop.permute.xlu1 %182 }
 0x1c4   :  { %v187_v46 = vmul.f32 %v1026_v42, %v183_v47 }
 0x1c6   :  { %209 = vmatpush.msra.mxu2 %v187_v46 }
 0x1c8   :  { %210 = vmatpush.msra.mxu2 %v174_v36  ;;  %v271_v36 = vld [vmem:[%s1251_s1 + $0x10] sm:$0xff] }
 0x1ca   :  { %211 = vmatpush.msra.mxu2 %v173_v41 }
 0x1cc   :  { %212 = vmatpush.msra.mxu2 %v181_v50 }
 0x1ce   :  { %213 = vmatpush.msra.mxu2 %v180_v51 }
 0x1cf   :  { %812 = vmatmul.msk.f32.vlgmr.msra.gmra.mxu2 %vm191_vm6, %v189_v52 }
 0x1d0   :  { %228 = vmatpush.msrb.mxu2 %v955_v1 }
 0x1d2   :  { %229 = vmatpush.msrb.mxu2 %v957_v2 }
 0x1d4   :  { %230 = vmatpush.msrb.mxu2 %v960_v3 }
 0x1d6   :  { %231 = vmatpush.msrb.mxu2 %v963_v4 }
 0x1d7   :  { %813 = vmatmul.msk.f32.gmra.mxu2 %vm191_vm6, %v190_v53 }
 0x1d8   :  { %232 = vmatpush.msrb.mxu2 %v969_v5 }
 0x1da   :  { %233 = vmatpush.msrb.mxu2 %v972_v6 }
 0x1dc   :  { %234 = vmatpush.msrb.mxu2 %v975_v7 }
 0x1de   :  { %235 = vmatpush.msrb.mxu2 %v978_v8 }
 0x1e0   :  { %236 = vmatpush.msrb.mxu2 %v981_v9 }
 0x1e2   :  { %237 = vmatpush.msrb.mxu2 %v984_v10 }
 0x1e4   :  { %238 = vmatpush.msrb.mxu2 %v987_v11 }
 0x1e6   :  { %239 = vmatpush.msrb.mxu2 %v990_v12 }
 0x1e8   :  { %240 = vmatpush.msrb.mxu2 %v993_v13 }
 0x1ea   :  { %241 = vmatpush.msrb.mxu2 %v995_v14 }
 0x1ec   :  { %242 = vmatpush.msrb.mxu2 %v998_v15 }
 0x1ee   :  { %243 = vmatpush.msrb.mxu2 %v1001_v16 }
 0x252   :  { %v215_v55 = vpop.f32.mrf.mxu2 }
 0x253   :  { %v222_v56 = vadd.f32 %v221_v54, %v215_v55  ;;  %v302_v54 = vld [vmem:[#allocation2 + $0x80] sm:$0xff] }
 0x255   :  { %244 = vmatmul.f32.vlgmr.msrb.gmra.mxu2 %v222_v56  ;;  %v227_v57 = vmul.f32 %v222_v56, %v222_v56 }
 0x25a   :  { %v1058_v58 = vpop.f32.mrf.mxu2 }
 0x25d   :  { %247 = vmatmul.f32.gmra.mxu2 %v227_v57 }
 0x2d8   :  { %v245_v59 = vpop.f32.mrf.mxu2 }
 0x2d9   :  { %v251_v60 = vmul.f32 %v245_v59, %v245_v59  ;;  %v254_v25 = vsub.f32 %v222_v56, %v245_v59 }
 0x2e0   :  { %v248_v61 = vpop.f32.mrf.mxu2 }
 0x2e1   :  { %v252_v62 = vsub.f32 %v248_v61, %v251_v60  ;;  %v223_v60 = vld [vmem:[#allocation2 + $0x90] sm:$0xff]  ;;  %v303_v61 = vld [vmem:[#allocation2 + $0x88] sm:$0xff] }
 0x2e3   :  { %v253_v63 = vmax.f32 %v252_v62, 0.0 }
 0x2e5   :  { %v255_v0 = vadd.f32 1e-05, %v253_v63  ;;  %v224_v63 = vadd.f32 %v223_v60, %v1058_v58  ;;  %v355_v58 = vld [vmem:[%s1251_s1 + $0x18] sm:$0xff] }
 0x2e7   :  { %840 = vrsqrt.f32 %v255_v0  ;;  %vm262_vm8 = vweird.f32 %v255_v0 }
 0x2ed   :  { %v841_v17 = vpop.eup %840 }
 0x2ee   :  { %v257_v18 = vmul.f32 %v841_v17, %v255_v0  ;;  %vm263_vm7 = vweird.f32 %v841_v17 }
 0x2ef   :  { %vm264_vm9 = vmor %vm262_vm8, %vm263_vm7 }
 0x2f0   :  { %v258_v19 = vmul.f32 %v841_v17, %v257_v18 }
 0x2f2   :  { %v259_v20 = vmul.f32 0.5, %v258_v19 }
 0x2f4   :  { %v260_v21 = vsub.f32 1.5, %v259_v20 }
 0x2f6   :  { %v261_v22 = vmul.f32 %v841_v17, %v260_v21 }
 0x2f8   :  { %v265_v24 = vsel %vm264_vm9, %v841_v17, %v261_v22 }
 0x2f9   :  { %v266_v26 = vmul.f32 %v265_v24, %v225_v23  ;;  %v356_v24 = vld [vmem:[%s1251_s1 + $0x20] sm:$0xff] }
 0x2fb   :  { %v267_v28 = vmul.f32 %v266_v26, %v254_v25  ;;  %v386_v25 = vld [vmem:[#allocation2 + $0x98] sm:$0xff] }
 0x2fd   :  { %v268_v29 = vadd.f32 %v267_v28, %v226_v27 }
 0x2ff   :  { %v269_v30 = vmul.f32 0.01, %v268_v29 }
 0x301   :  { %v270_v31 = vmax.f32 %v268_v29, %v269_v30 }
 0x303   :  { %272 = vrot.lane.b32.xlu1 %v270_v31, %s910_s6  ;;  %275 = vrot.lane.b32.xlu0 %v270_v31, %s911_s0 }
 0x375   :  { %v276_v32 = vpop.permute.xlu0 %275  ;;  %v273_v34 = vpop.permute.xlu1 %272 }
 0x376   :  { %v277_v33 = vmul.f32 %v1026_v42, %v276_v32  ;;  %v274_v35 = vmul.f32 %v1030_v48, %v273_v34 }
 0x378   :  { %295 = vmatpush.msra.mxu3 %v277_v33 }
 0x37a   :  { %296 = vmatpush.msra.mxu3 %v270_v31 }
 0x37c   :  { %297 = vmatpush.msra.mxu3 %v274_v35 }
 0x37d   :  { %814 = vmatmul.msk.f32.vlgmr.msra.gmra.mxu3 %vm191_vm6, %v271_v36 }
 0x37e   :  { %305 = vmatpush.msrb.mxu3 %v955_v1 }
 0x380   :  { %306 = vmatpush.msrb.mxu3 %v957_v2 }
 0x382   :  { %307 = vmatpush.msrb.mxu3 %v960_v3 }
 0x384   :  { %308 = vmatpush.msrb.mxu3 %v963_v4 }
 0x386   :  { %309 = vmatpush.msrb.mxu3 %v969_v5 }
 0x388   :  { %310 = vmatpush.msrb.mxu3 %v972_v6 }
 0x38a   :  { %311 = vmatpush.msrb.mxu3 %v975_v7 }
 0x38c   :  { %312 = vmatpush.msrb.mxu3 %v978_v8 }
 0x38e   :  { %313 = vmatpush.msrb.mxu3 %v981_v9 }
 0x390   :  { %314 = vmatpush.msrb.mxu3 %v984_v10 }
 0x392   :  { %315 = vmatpush.msrb.mxu3 %v987_v11 }
 0x394   :  { %316 = vmatpush.msrb.mxu3 %v990_v12 }
 0x396   :  { %317 = vmatpush.msrb.mxu3 %v993_v13 }
 0x398   :  { %318 = vmatpush.msrb.mxu3 %v995_v14 }
 0x39a   :  { %319 = vmatpush.msrb.mxu3 %v998_v15 }
 0x39c   :  { %320 = vmatpush.msrb.mxu3 %v1001_v16 }
 0x39e   :  { %655 = vmatpush.msra.mxu3 %v955_v1 }
 0x3a0   :  { %656 = vmatpush.msra.mxu3 %v957_v2 }
 0x3a2   :  { %657 = vmatpush.msra.mxu3 %v960_v3 }
 0x3a4   :  { %658 = vmatpush.msra.mxu3 %v963_v4 }
 0x3a6   :  { %659 = vmatpush.msra.mxu3 %v969_v5 }
 0x3a8   :  { %660 = vmatpush.msra.mxu3 %v972_v6 }
 0x3aa   :  { %661 = vmatpush.msra.mxu3 %v975_v7 }
 0x3ac   :  { %662 = vmatpush.msra.mxu3 %v978_v8 }
 0x3ae   :  { %663 = vmatpush.msra.mxu3 %v981_v9 }
 0x3b0   :  { %664 = vmatpush.msra.mxu3 %v984_v10 }
 0x3b2   :  { %665 = vmatpush.msra.mxu3 %v987_v11 }
 0x3b4   :  { %666 = vmatpush.msra.mxu3 %v990_v12 }
 0x3b6   :  { %667 = vmatpush.msra.mxu3 %v993_v13 }
 0x3b8   :  { %668 = vmatpush.msra.mxu3 %v995_v14 }
 0x3ba   :  { %669 = vmatpush.msra.mxu3 %v998_v15 }
 0x3bc   :  { %670 = vmatpush.msra.mxu3 %v1001_v16 }
 0x400   :  { %v299_v38 = vpop.f32.mrf.mxu3 }
 0x401   :  { %v300_v39 = vadd.f32 %v299_v38, %v278_v37 }
 0x403   :  { %321 = vmatmul.f32.vlgmr.msrb.gmra.mxu3 %v300_v39  ;;  %v304_v40 = vmul.f32 %v300_v39, %v300_v39 }
 0x40b   :  { %324 = vmatmul.f32.gmra.mxu3 %v304_v40 }
 0x486   :  { %v322_v41 = vpop.f32.mrf.mxu3 }
 0x487   :  { %v328_v43 = vmul.f32 %v322_v41, %v322_v41  ;;  %v331_v57 = vsub.f32 %v300_v39, %v322_v41 }
 0x48e   :  { %v325_v44 = vpop.f32.mrf.mxu3 }
 0x48f   :  { %v329_v45 = vsub.f32 %v325_v44, %v328_v43  ;;  %v390_v43 = vld [vmem:[#allocation2 + $0xa0] sm:$0xff] }
 0x491   :  { %v330_v47 = vmax.f32 %v329_v45, 0.0 }
 0x493   :  { %v332_v46 = vadd.f32 1e-05, %v330_v47 }
 0x495   :  { %842 = vrsqrt.f32 %v332_v46  ;;  %vm339_vm11 = vweird.f32 %v332_v46 }
 0x49b   :  { %v843_v49 = vpop.eup %842 }
 0x49c   :  { %v334_v50 = vmul.f32 %v843_v49, %v332_v46  ;;  %vm340_vm10 = vweird.f32 %v843_v49  ;;  %v391_v46 = vld [vmem:[#allocation2 + $0xa8] sm:$0xff] }
 0x49d   :  { %vm341_vm12 = vmor %vm339_vm11, %vm340_vm10 }
 0x49e   :  { %v335_v51 = vmul.f32 %v843_v49, %v334_v50 }
 0x4a0   :  { %v336_v52 = vmul.f32 0.5, %v335_v51 }
 0x4a2   :  { %v337_v53 = vsub.f32 1.5, %v336_v52 }
 0x4a4   :  { %v338_v55 = vmul.f32 %v843_v49, %v337_v53 }
 0x4a6   :  { %v342_v56 = vsel %vm341_vm12, %v843_v49, %v338_v55 }
 0x4a7   :  { %v343_v59 = vmul.f32 %v342_v56, %v302_v54 }
 0x4a9   :  { %v344_v62 = vmul.f32 %v343_v59, %v331_v57  ;;  %v436_v57 = vld [vmem:[%s1251_s1 + $0x28] sm:$0xff] }
 0x4ab   :  { %v345_v0 = vadd.f32 %v344_v62, %v303_v61 }
 0x4ad   :  { %v346_v17 = vadd.f32 %v345_v0, %v224_v63  ;;  %v388_v63 = vld [vmem:[#allocation2 + $0xc8] sm:$0xff]  ;;  %v468_v0 = vld [vmem:[#allocation2 + $0xc0] sm:$0xff] }
 0x4af   :  { %v347_v18 = vmul.f32 0.01, %v346_v17 }
 0x4b1   :  { %v348_v19 = vmax.f32 %v346_v17, %v347_v18 }
 0x4b3   :  { %349 = vrot.lane.b32.xlu0 %v348_v19, %s910_s6  ;;  %352 = vrot.lane.b32.xlu2 %v348_v19, %s911_s0 }
 0x50d   :  { %v353_v20 = vpop.permute.xlu2 %352 }
 0x50e   :  { %v354_v21 = vmul.f32 %v1026_v42, %v353_v20 }
 0x510   :  { %376 = vmatpush.msra.mxu1 %v354_v21 }
 0x512   :  { %377 = vmatpush.msra.mxu1 %v348_v19 }
 0x525   :  { %v350_v22 = vpop.permute.xlu0 %349 }
 0x526   :  { %v351_v23 = vmul.f32 %v1030_v48, %v350_v22 }
 0x528   :  { %378 = vmatpush.msra.mxu1 %v351_v23 }
 0x529   :  { %815 = vmatmul.msk.f32.vlgmr.msra.gmra.mxu1 %vm191_vm6, %v355_v58 }
 0x52a   :  { %393 = vmatpush.msrb.mxu1 %v955_v1 }
 0x52c   :  { %394 = vmatpush.msrb.mxu1 %v957_v2 }
 0x52e   :  { %395 = vmatpush.msrb.mxu1 %v960_v3 }
 0x530   :  { %396 = vmatpush.msrb.mxu1 %v963_v4 }
 0x531   :  { %816 = vmatmul.msk.f32.gmra.mxu1 %vm191_vm6, %v356_v24 }
 0x532   :  { %397 = vmatpush.msrb.mxu1 %v969_v5 }
 0x534   :  { %398 = vmatpush.msrb.mxu1 %v972_v6 }
 0x536   :  { %399 = vmatpush.msrb.mxu1 %v975_v7 }
 0x538   :  { %400 = vmatpush.msrb.mxu1 %v978_v8 }
 0x53a   :  { %401 = vmatpush.msrb.mxu1 %v981_v9 }
 0x53c   :  { %402 = vmatpush.msrb.mxu1 %v984_v10 }
 0x53e   :  { %403 = vmatpush.msrb.mxu1 %v987_v11 }
 0x540   :  { %404 = vmatpush.msrb.mxu1 %v990_v12 }
 0x542   :  { %405 = vmatpush.msrb.mxu1 %v993_v13 }
 0x544   :  { %406 = vmatpush.msrb.mxu1 %v995_v14 }
 0x546   :  { %407 = vmatpush.msrb.mxu1 %v998_v15 }
 0x548   :  { %408 = vmatpush.msrb.mxu1 %v1001_v16 }
 0x5a6   :  { %v380_v26 = vpop.f32.mrf.mxu1 }
 0x5a7   :  { %v387_v27 = vadd.f32 %v386_v25, %v380_v26  ;;  %v520_v26 = vld [vmem:[%s1251_s1 + $0x30] sm:$0xff] }
 0x5a9   :  { %409 = vmatmul.f32.vlgmr.msrb.gmra.mxu1 %v387_v27  ;;  %v392_v28 = vmul.f32 %v387_v27, %v387_v27 }
 0x5ae   :  { %v1129_v29 = vpop.f32.mrf.mxu1 }
 0x5af   :  { %v389_v18 = vadd.f32 %v388_v63, %v1129_v29 }
 0x5b1   :  { %412 = vmatmul.f32.gmra.mxu1 %v392_v28 }
 0x626   :  { %v410_v30 = vpop.f32.mrf.mxu1 }
 0x627   :  { %v416_v31 = vmul.f32 %v410_v30, %v410_v30  ;;  %v419_v45 = vsub.f32 %v387_v27, %v410_v30  ;;  %v558_v27 = vld [vmem:[#allocation2 + $0xd0] sm:$0xff] }
 0x62e   :  { %v413_v32 = vpop.f32.mrf.mxu1 }
 0x62f   :  { %v417_v33 = vsub.f32 %v413_v32, %v416_v31 }
 0x631   :  { %v418_v34 = vmax.f32 %v417_v33, 0.0 }
 0x633   :  { %v420_v35 = vadd.f32 1e-05, %v418_v34 }
 0x635   :  { %844 = vrsqrt.f32 %v420_v35  ;;  %vm427_vm14 = vweird.f32 %v420_v35 }
 0x63b   :  { %v845_v36 = vpop.eup %844 }
 0x63c   :  { %v422_v37 = vmul.f32 %v845_v36, %v420_v35  ;;  %vm428_vm13 = vweird.f32 %v845_v36 }
 0x63d   :  { %vm429_vm15 = vmor %vm427_vm14, %vm428_vm13 }
 0x63e   :  { %v423_v38 = vmul.f32 %v845_v36, %v422_v37 }
 0x640   :  { %v424_v39 = vmul.f32 0.5, %v423_v38 }
 0x642   :  { %v425_v40 = vsub.f32 1.5, %v424_v39 }
 0x644   :  { %v426_v41 = vmul.f32 %v845_v36, %v425_v40 }
 0x646   :  { %v430_v44 = vsel %vm429_vm15, %v845_v36, %v426_v41 }
 0x647   :  { %v431_v47 = vmul.f32 %v430_v44, %v390_v43  ;;  %v564_v44 = vld [vmem:[#allocation2 + $0xd8] sm:$0xff] }
 0x649   :  { %v432_v49 = vmul.f32 %v431_v47, %v419_v45 }
 0x64b   :  { %v433_v50 = vadd.f32 %v432_v49, %v391_v46  ;;  %v565_v49 = vld [vmem:[#allocation2 + $0xe0] sm:$0xff] }
 0x64d   :  { %v434_v51 = vmul.f32 0.01, %v433_v50 }
 0x64f   :  { %v435_v52 = vmax.f32 %v433_v50, %v434_v51 }
 0x651   :  { %437 = vrot.lane.b32.xlu2 %v435_v52, %s910_s6  ;;  %440 = vrot.lane.b32.xlu1 %v435_v52, %s911_s0 }
 0x6ab   :  { %v438_v55 = vpop.permute.xlu2 %437 }
 0x6ac   :  { %v439_v56 = vmul.f32 %v1030_v48, %v438_v55 }
 0x6c3   :  { %v441_v53 = vpop.permute.xlu1 %440 }
 0x6c4   :  { %v442_v54 = vmul.f32 %v1026_v42, %v441_v53 }
 0x6c6   :  { %460 = vmatpush.msra.mxu2 %v442_v54  ;;  %v522_v54 = vld [vmem:[%s1251_s1 + $0x40] sm:$0xff] }
 0x6c8   :  { %461 = vmatpush.msra.mxu2 %v435_v52 }
 0x6ca   :  { %462 = vmatpush.msra.mxu2 %v439_v56 }
 0x6cb   :  { %817 = vmatmul.msk.f32.vlgmr.msra.gmra.mxu2 %vm191_vm6, %v436_v57 }
 0x6cc   :  { %567 = vmatpush.msrb.mxu2 %v955_v1  ;;  %v443_v1 = vld [vmem:[#allocation2 + $0xb0] sm:$0xff] }
 0x6ce   :  { %568 = vmatpush.msrb.mxu2 %v957_v2 }
 0x6d0   :  { %569 = vmatpush.msrb.mxu2 %v960_v3 }
 0x6d2   :  { %570 = vmatpush.msrb.mxu2 %v963_v4 }
 0x6d4   :  { %571 = vmatpush.msrb.mxu2 %v969_v5 }
 0x6d6   :  { %572 = vmatpush.msrb.mxu2 %v972_v6 }
 0x6d8   :  { %573 = vmatpush.msrb.mxu2 %v975_v7 }
 0x6da   :  { %574 = vmatpush.msrb.mxu2 %v978_v8 }
 0x6dc   :  { %575 = vmatpush.msrb.mxu2 %v981_v9 }
 0x6de   :  { %576 = vmatpush.msrb.mxu2 %v984_v10 }
 0x6e0   :  { %577 = vmatpush.msrb.mxu2 %v987_v11 }
 0x6e2   :  { %578 = vmatpush.msrb.mxu2 %v990_v12 }
 0x6e4   :  { %579 = vmatpush.msrb.mxu2 %v993_v13 }
 0x6e6   :  { %580 = vmatpush.msrb.mxu2 %v995_v14 }
 0x6e8   :  { %581 = vmatpush.msrb.mxu2 %v998_v15 }
 0x6ea   :  { %582 = vmatpush.msrb.mxu2 %v1001_v16  ;;  %v467_v16 = vld [vmem:[#allocation2 + $0xb8] sm:$0xff] }
 0x74e   :  { %v464_v2 = vpop.f32.mrf.mxu2 }
 0x74f   :  { %v465_v3 = vadd.f32 %v464_v2, %v443_v1  ;;  %v610_v2 = vld [vmem:[%s1251_s1 + $0x48] sm:$0xff] }
 0x751   :  { %486 = vmatmul.f32.vlgmr.msrb.gmra.mxu0 %v465_v3  ;;  %v469_v4 = vmul.f32 %v465_v3, %v465_v3 }
 0x759   :  { %489 = vmatmul.f32.gmra.mxu0 %v469_v4 }
 0x7ce   :  { %v487_v5 = vpop.f32.mrf.mxu0 }
 0x7cf   :  { %v493_v6 = vmul.f32 %v487_v5, %v487_v5  ;;  %v496_v61 = vsub.f32 %v465_v3, %v487_v5  ;;  %v611_v3 = vld [vmem:[%s1251_s1 + $0x50] sm:$0xff]  ;;  %v521_v5 = vld [vmem:[%s1251_s1 + $0x38] sm:$0xff] }
 0x7d6   :  { %v490_v7 = vpop.f32.mrf.mxu0 }
 0x7d7   :  { %v494_v8 = vsub.f32 %v490_v7, %v493_v6  ;;  %v618_v6 = vld [vmem:[#allocation2 + $0xe8] sm:$0xff] }
 0x7d9   :  { %v495_v9 = vmax.f32 %v494_v8, 0.0 }
 0x7db   :  { %v497_v10 = vadd.f32 1e-05, %v495_v9  ;;  %v619_v9 = vld [vmem:[#allocation2 + $0xf0] sm:$0xff] }
 0x7dd   :  { %846 = vrsqrt.f32 %v497_v10  ;;  %vm504_vm1 = vweird.f32 %v497_v10 }
 0x7e3   :  { %v847_v11 = vpop.eup %846 }
 0x7e4   :  { %v499_v12 = vmul.f32 %v847_v11, %v497_v10  ;;  %vm505_vm0 = vweird.f32 %v847_v11 }
 0x7e5   :  { %vm506_vm2 = vmor %vm504_vm1, %vm505_vm0 }
 0x7e6   :  { %v500_v13 = vmul.f32 %v847_v11, %v499_v12 }
 0x7e8   :  { %v501_v14 = vmul.f32 0.5, %v500_v13 }
 0x7ea   :  { %v502_v15 = vsub.f32 1.5, %v501_v14 }
 0x7ec   :  { %v503_v59 = vmul.f32 %v847_v11, %v502_v15 }
 0x7ee   :  { %v507_v60 = vsel %vm506_vm2, %v847_v11, %v503_v59 }
 0x7ef   :  { %v508_v62 = vmul.f32 %v507_v60, %v467_v16 }
 0x7f1   :  { %v509_v17 = vmul.f32 %v508_v62, %v496_v61 }
 0x7f3   :  { %v510_v19 = vadd.f32 %v509_v17, %v468_v0 }
 0x7f5   :  { %v511_v20 = vadd.f32 %v510_v19, %v389_v18 }
 0x7f7   :  { %v512_v21 = vmul.f32 0.01, %v511_v20 }
 0x7f9   :  { %v513_v22 = vmax.f32 %v511_v20, %v512_v21 }
 0x7fb   :  { %514 = vrot.lane.b32.xlu1 %v513_v22, %s910_s6  ;;  %517 = vrot.lane.b32.xlu0 %v513_v22, %s911_s0 }
 0x86d   :  { %v518_v23 = vpop.permute.xlu0 %517  ;;  %v515_v24 = vpop.permute.xlu1 %514 }
 0x86e   :  { %v519_v58 = vmul.f32 %v1026_v42, %v518_v23  ;;  %v516_v25 = vmul.f32 %v1030_v48, %v515_v24 }
 0x870   :  { %545 = vmatpush.msra.mxu0 %v519_v58  ;;  %824 = vmatpush.msra.mxu1 %v519_v58 }
 0x872   :  { %546 = vmatpush.msra.mxu0 %v513_v22  ;;  %825 = vmatpush.msra.mxu1 %v513_v22 }
 0x874   :  { %547 = vmatpush.msra.mxu0 %v516_v25  ;;  %826 = vmatpush.msra.mxu1 %v516_v25 }
 0x875   :  { %818 = vmatmul.msk.f32.vlgmr.msra.gmra.mxu0 %vm191_vm6, %v520_v26  ;;  %820 = vmatmul.msk.f32.vlgmr.msra.gmra.mxu1 %vm191_vm6, %v522_v54 }
 0x87d   :  { %819 = vmatmul.msk.f32.gmra.mxu0 %vm191_vm6, %v521_v5  ;;  %v778_v5 = vld [vmem:[%s1253_s3 + $0x58] sm:$0xff] }
 0x8f2   :  { %v549_v28 = vpop.f32.mrf.mxu0  ;;  %v1180_v4 = vpop.f32.mrf.mxu1 }
 0x8f3   :  { %v559_v29 = vadd.f32 %v558_v27, %v549_v28  ;;  %v649_v27 = vld [vmem:[#allocation2 + $0xf8] sm:$0xff] }
 0x8f5   :  { %583 = vmatmul.f32.vlgmr.msrb.gmra.mxu2 %v559_v29  ;;  %v566_v30 = vmul.f32 %v559_v29, %v559_v29 }
 0x8fd   :  { %586 = vmatmul.f32.gmra.mxu2 %v566_v30  ;;  %v552_v30 = vpop.f32.mrf.mxu0 }
 0x978   :  { %v584_v31 = vpop.f32.mrf.mxu2 }
 0x979   :  { %v590_v32 = vmul.f32 %v584_v31, %v584_v31  ;;  %v593_v47 = vsub.f32 %v559_v29, %v584_v31  ;;  %v560_v31 = vld [vmem:[#allocation2 + $0x118] sm:$0xff] }
 0x980   :  { %v587_v33 = vpop.f32.mrf.mxu2 }
 0x981   :  { %v591_v34 = vsub.f32 %v587_v33, %v590_v32 }
 0x983   :  { %v592_v35 = vmax.f32 %v591_v34, 0.0 }
 0x985   :  { %v594_v36 = vadd.f32 1e-05, %v592_v35  ;;  %v651_v35 = vld [vmem:[#allocation2 + $0x108] sm:$0xff] }
 0x987   :  { %848 = vrsqrt.f32 %v594_v36  ;;  %vm601_vm4 = vweird.f32 %v594_v36 }
 0x98d   :  { %v849_v37 = vpop.eup %848 }
 0x98e   :  { %v596_v38 = vmul.f32 %v849_v37, %v594_v36  ;;  %vm602_vm3 = vweird.f32 %v849_v37  ;;  %v562_v36 = vadd.f32 %v560_v31, %v552_v30 }
 0x98f   :  { %vm603_vm5 = vmor %vm601_vm4, %vm602_vm3 }
 0x990   :  { %v597_v39 = vmul.f32 %v849_v37, %v596_v38 }
 0x992   :  { %v598_v40 = vmul.f32 0.5, %v597_v39 }
 0x994   :  { %v599_v41 = vsub.f32 1.5, %v598_v40  ;;  %v650_v40 = vld [vmem:[#allocation2 + $0x100] sm:$0xff] }
 0x996   :  { %v600_v43 = vmul.f32 %v849_v37, %v599_v41 }
 0x998   :  { %v604_v45 = vsel %vm603_vm5, %v849_v37, %v600_v43 }
 0x999   :  { %v605_v46 = vmul.f32 %v604_v45, %v564_v44 }
 0x99b   :  { %v606_v50 = vmul.f32 %v605_v46, %v593_v47 }
 0x99d   :  { %v607_v51 = vadd.f32 %v606_v50, %v565_v49  ;;  %v561_v49 = vld [vmem:[#allocation2 + $0x120] sm:$0xff]  ;;  %v652_v50 = vld [vmem:[#allocation2 + $0x110] sm:$0xff] }
 0x99f   :  { %v608_v52 = vmul.f32 0.01, %v607_v51 }
 0x9a1   :  { %v609_v53 = vmax.f32 %v607_v51, %v608_v52 }
 0x9a3   :  { %612 = vrot.lane.b32.xlu0 %v609_v53, %s910_s6  ;;  %615 = vrot.lane.b32.xlu2 %v609_v53, %s911_s0 }
 0x9fd   :  { %v616_v55 = vpop.permute.xlu2 %615 }
 0x9fe   :  { %v617_v56 = vmul.f32 %v1026_v42, %v616_v55 }
 0xa00   :  { %639 = vmatpush.msrb.mxu1 %v617_v56 }
 0xa02   :  { %640 = vmatpush.msrb.mxu1 %v609_v53  ;;  %v563_v53 = vadd.f32 %v561_v49, %v1180_v4  ;;  %v779_v4 = vld [vmem:[%s1253_s3 + $0x60] sm:$0xff] }
 0xa15   :  { %v613_v57 = vpop.permute.xlu0 %612 }
 0xa16   :  { %v614_v1 = vmul.f32 %v1030_v48, %v613_v57 }
 0xa18   :  { %641 = vmatpush.msrb.mxu1 %v614_v1  ;;  %v782_v1 = vld [vmem:[%s1253_s3 + $0x78] sm:$0xff] }
 0xa19   :  { %821 = vmatmul.msk.f32.vlgmr.msrb.gmra.mxu1 %vm191_vm6, %v610_v2  ;;  %v781_v2 = vld [vmem:[%s1253_s3 + $0x70] sm:$0xff] }
 0xa1a   :  { %785 = vmatpush.msra.mxu1 %v782_v1 }
 0xa1c   :  { %786 = vmatpush.msra.mxu1 %v781_v2 }
 0xa21   :  { %822 = vmatmul.msk.f32.gmra.mxu1 %vm191_vm6, %v611_v3  ;;  %v780_v3 = vld [vmem:[%s1253_s3 + $0x68] sm:$0xff] }
 0xa22   :  { %787 = vmatpush.msra.mxu1 %v780_v3 }
 0xa24   :  { %788 = vmatpush.msra.mxu1 %v779_v4 }
 0xa26   :  { %789 = vmatpush.msra.mxu1 %v778_v5 }
 0xa96   :  { %v643_v7 = vpop.f32.mrf.mxu1 }
 0xa97   :  { %v644_v8 = vadd.f32 %v643_v7, %v618_v6  ;;  %v777_v6 = vld [vmem:[%s1253_s3 + $0x50] sm:$0xff]  ;;  %v776_v7 = vld [vmem:[%s1253_s3 + $0x48] sm:$0xff] }
 0xa98   :  { %790 = vmatpush.msra.mxu1 %v777_v6 }
 0xa99   :  { %671 = vmatmul.f32.vlgmr.msra.gmra.mxu3 %v644_v8  ;;  %v653_v12 = vmul.f32 %v644_v8, %v644_v8 }
 0xa9a   :  { %791 = vmatpush.msra.mxu1 %v776_v7 }
 0xa9e   :  { %v646_v10 = vpop.f32.mrf.mxu1 }
 0xa9f   :  { %v647_v11 = vadd.f32 %v646_v10, %v619_v9  ;;  %v774_v9 = vld [vmem:[%s1253_s3 + $0x38] sm:$0xff]  ;;  %v773_v10 = vld [vmem:[%s1253_s3 + $0x30] sm:$0xff] }
 0xaa1   :  { %674 = vmatmul.f32.gmra.mxu3 %v647_v11  ;;  %v654_v13 = vmul.f32 %v647_v11, %v647_v11 }
 0xaa9   :  { %677 = vmatmul.f32.gmra.mxu3 %v653_v12 }
 0xab1   :  { %680 = vmatmul.f32.gmra.mxu3 %v654_v13  ;;  %v772_v13 = vld [vmem:[%s1253_s3 + $0x28] sm:$0xff] }
 0xb1c   :  { %v672_v14 = vpop.f32.mrf.mxu3 }
 0xb1d   :  { %v684_v16 = vmul.f32 %v672_v14, %v672_v14  ;;  %v690_v32 = vsub.f32 %v644_v8, %v672_v14  ;;  %v775_v8 = vld [vmem:[%s1253_s3 + $0x40] sm:$0xff] }
 0xb1e   :  { %792 = vmatpush.msra.mxu1 %v775_v8 }
 0xb20   :  { %793 = vmatpush.msra.mxu1 %v774_v9 }
 0xb22   :  { %794 = vmatpush.msra.mxu1 %v773_v10 }
 0xb24   :  { %v675_v15 = vpop.f32.mrf.mxu3  ;;  %795 = vmatpush.msra.mxu1 %v772_v13 }
 0xb25   :  { %v685_v63 = vmul.f32 %v675_v15, %v675_v15  ;;  %v691_v45 = vsub.f32 %v647_v11, %v675_v15  ;;  %v771_v15 = vld [vmem:[%s1253_s3 + $0x20] sm:$0xff] }
 0xb26   :  { %796 = vmatpush.msra.mxu1 %v771_v15 }
 0xb2c   :  { %v678_v59 = vpop.f32.mrf.mxu3 }
 0xb2d   :  { %v686_v60 = vsub.f32 %v678_v59, %v684_v16 }
 0xb2f   :  { %v688_v61 = vmax.f32 %v686_v60, 0.0 }
 0xb31   :  { %v692_v62 = vadd.f32 1e-05, %v688_v61 }
 0xb33   :  { %850 = vrsqrt.f32 %v692_v62  ;;  %vm700_vm8 = vweird.f32 %v692_v62 }
 0xb34   :  { %v681_v0 = vpop.f32.mrf.mxu3 }
 0xb35   :  { %v687_v17 = vsub.f32 %v681_v0, %v685_v63  ;;  %v726_v63 = vld [vmem:[%s1251_s1 + $0x58] sm:$0xff]  ;;  %v769_v0 = vld [vmem:[%s1253_s3 + $0x10] sm:$0xff] }
 0xb37   :  { %v689_v18 = vmax.f32 %v687_v17, 0.0  ;;  %v767_v17 = vld [vmem:[%s1253_s3] sm:$0xff] }
 0xb39   :  { %v851_v19 = vpop.eup %850  ;;  %v693_v20 = vadd.f32 1e-05, %v689_v18  ;;  %v762_v18 = vld [vmem:[#allocation2 + $0x128] sm:$0x1] }
 0xb3a   :  { %v695_v21 = vmul.f32 %v851_v19, %v692_v62  ;;  %vm701_vm7 = vweird.f32 %v851_v19 }
 0xb3b   :  { %852 = vrsqrt.f32 %v693_v20  ;;  %vm702_vm9 = vmor %vm700_vm8, %vm701_vm7  ;;  %vm710_vm11 = vweird.f32 %v693_v20 }
 0xb3c   :  { %v696_v22 = vmul.f32 %v851_v19, %v695_v21  ;;  %v764_v21 = vld [vmem:[#allocation2 + $0x148] sm:$0xff] }
 0xb3e   :  { %v697_v23 = vmul.f32 0.5, %v696_v22 }
 0xb40   :  { %v698_v58 = vsub.f32 1.5, %v697_v23 }
 0xb41   :  { %v853_v24 = vpop.eup %852 }
 0xb42   :  { %v699_v25 = vmul.f32 %v851_v19, %v698_v58  ;;  %v705_v26 = vmul.f32 %v853_v24, %v693_v20  ;;  %vm711_vm10 = vweird.f32 %v853_v24  ;;  %v835_v58 = vld [vmem:[#allocation2 + $0x130] ss:$0 sm:$0xff] }
 0xb43   :  { %vm712_vm12 = vmor %vm710_vm11, %vm711_vm10 }
 0xb44   :  { %v703_v28 = vsel %vm702_vm9, %v851_v19, %v699_v25  ;;  %v706_v29 = vmul.f32 %v853_v24, %v705_v26 }
 0xb45   :  { %v714_v33 = vmul.f32 %v703_v28, %v649_v27 }
 0xb46   :  { %v707_v34 = vmul.f32 0.5, %v706_v29 }
 0xb47   :  { %v716_v37 = vmul.f32 %v714_v33, %v690_v32 }
 0xb48   :  { %v708_v38 = vsub.f32 1.5, %v707_v34 }
 0xb49   :  { %v718_v39 = vadd.f32 %v716_v37, %v651_v35 }
 0xb4a   :  { %v709_v41 = vmul.f32 %v853_v24, %v708_v38 }
 0xb4b   :  { %v720_v43 = vadd.f32 %v718_v39, %v562_v36 }
 0xb4c   :  { %v713_v44 = vsel %vm712_vm12, %v853_v24, %v709_v41 }
 0xb4d   :  { %v715_v47 = vmul.f32 %v713_v44, %v650_v40  ;;  %v722_v46 = vmul.f32 0.01, %v720_v43 }
 0xb4f   :  { %v724_v51 = vmax.f32 %v720_v43, %v722_v46  ;;  %v717_v52 = vmul.f32 %v715_v47, %v691_v45 }
 0xb51   :  { %733 = vrot.lane.b32.xlu2 %v724_v51, %s911_s0  ;;  %v719_v54 = vadd.f32 %v717_v52, %v652_v50 }
 0xb53   :  { %v721_v55 = vadd.f32 %v719_v54, %v563_v53 }
 0xb55   :  { %v723_v56 = vmul.f32 0.01, %v721_v55 }
 0xb57   :  { %v725_v57 = vmax.f32 %v721_v55, %v723_v56 }
 0xb59   :  { %729 = vrot.lane.b32.xlu0 %v725_v57, %s910_s6  ;;  %735 = vrot.lane.b32.xlu1 %v725_v57, %s911_s0 }
 0xb61   :  { %727 = vrot.lane.b32.xlu1 %v724_v51, %s910_s6 }
 0xbab   :  { %v734_v11 = vpop.permute.xlu2 %733 }
 0xbac   :  { %v737_v16 = vmul.f32 %v1026_v42, %v734_v11 }
 0xbcb   :  { %v736_v12 = vpop.permute.xlu1 %735  ;;  %v730_v59 = vpop.permute.xlu0 %729 }
 0xbcc   :  { %v738_v14 = vmul.f32 %v1026_v42, %v736_v12  ;;  %v732_v61 = vmul.f32 %v1030_v48, %v730_v59  ;;  %v770_v42 = vld [vmem:[%s1253_s3 + $0x18] sm:$0xff] }
 0xbcd   :  { %797 = vmatpush.msra.mxu1 %v770_v42 }
 0xbce   :  { %752 = vmatpush.msrb.mxu0 %v738_v14 }
 0xbcf   :  { %798 = vmatpush.msra.mxu1 %v769_v0 }
 0xbd0   :  { %753 = vmatpush.msrb.mxu0 %v737_v16 }
 0xbd2   :  { %754 = vmatpush.msrb.mxu0 %v725_v57 }
 0xbd3   :  { %v728_v60 = vpop.permute.xlu1 %727 }
 0xbd4   :  { %755 = vmatpush.msrb.mxu0 %v724_v51  ;;  %v731_v62 = vmul.f32 %v1030_v48, %v728_v60  ;;  %v768_v48 = vld [vmem:[%s1253_s3 + $0x8] sm:$0xff] }
 0xbd5   :  { %799 = vmatpush.msra.mxu1 %v768_v48 }
 0xbd6   :  { %756 = vmatpush.msrb.mxu0 %v732_v61 }
 0xbd7   :  { %800 = vmatpush.msra.mxu1 %v767_v17 }
 0xbd8   :  { %757 = vmatpush.msrb.mxu0 %v731_v62 }
 0xbd9   :  { %823 = vmatmul.msk.f32.vlgmr.msrb.gmra.mxu0 %vm191_vm6, %v726_v63 }
 0xc56   :  { %v759_v19 = vpop.f32.mrf.mxu0 }
 0xc57   :  { %v763_v20 = vadd.f32 %v762_v18, %v759_v19 }
 0xc59   :  { %v765_v22 = vperm.slane %v763_v20, 0 }
 0xc5b   :  { %v766_v23 = vmul.f32 %v765_v22, %v764_v21 }
 0xc5d   :  { %801 = vmatmul.f32.vlgmr.msra.gmra.mxu1 %v766_v23 }
 0xcda   :  { %v802_v24 = vpop.f32.mrf.mxu1 }
 0xcdb   :  { %v803_v25 = vadd.f32 %v835_v58, %v802_v24 }
 0xcdd   :  { %805 = vst [vmem:[%s1255_s5] sm:$0xff] %v803_v25 }
 0xcde   :  { %810 = vsyncpa [#allocation3], 1 }
 0xcdf   :  { %811 = vsyncpa [#allocation5], 1 }

</bundles_post_ra>
